<compile_context>
chip_gen: v6e
topology: v6e:2x2x1
jax: 0.10.0
libtpu: 0.0.40
codegen_flags: <defaults>
</compile_context>

<pallas_src>
import jax
import jax.numpy as jnp
from jax.experimental import pallas as pl
from jax.experimental.pallas import tpu as pltpu


# -----------------------------------------------------------------------------
# Fused Pallas kernel
# -----------------------------------------------------------------------------
def _gelu_exact(x):
    # exact (erf-based) GELU, matching torch.nn.GELU() default
    return 0.5 * x * (1.0 + jax.lax.erf(x * 0.7071067811865476))


def fused_forward_kernel(xpad_ref,   # (H+2, W+2, Cin)  padded NHWC image (one batch element)
                         convw_ref,  # (9, Cin, Cout)   index = kh*3 + kw
                         convb_ref,  # (1, Cout)
                         lnw_ref,    # (1, Cout)
                         lnb_ref,    # (1, Cout)
                         fcw_ref,    # (Cout, Dout)
                         fcb_ref,    # (1, Dout)
                         out_ref,    # (N, Dout)        N = (H/2)*(W/2)
                         ys_ref):    # VMEM scratch (H, W, Cout)
    Hp, Wp, Cin = xpad_ref.shape
    H, W = Hp - 2, Wp - 2
    H2, W2 = H // 2, W // 2
    Cout = convw_ref.shape[-1]

    # --- Conv2d(k=3, s=1, pad=1): nine shifted-window GEMMs, f32 accumulation.
    acc = jnp.zeros((H * W, Cout), jnp.float32)
    for kh in range(3):
        for kw in range(3):
            patch = xpad_ref[pl.ds(kh, H), pl.ds(kw, W), :]        # (H, W, Cin)
            acc = acc + jnp.dot(patch.reshape(H * W, Cin),
                                convw_ref[kh * 3 + kw],
                                preferred_element_type=jnp.float32)
    acc = acc + convb_ref[...]                                     # + bias

    # --- GELU, staged into VMEM scratch laid out (h, w, c) for pooling.
    ys_ref[...] = _gelu_exact(acc).reshape(H, W, Cout)

    # --- AvgPool2d(2): pool W via strided in-VMEM reads, then pool H by
    #     pairing consecutive rows (pure-major reshape + static index).
    we = ys_ref[:, pl.ds(0, W2, 2), :]                             # (H, W2, C)  even w
    wo = ys_ref[:, pl.ds(1, W2, 2), :]                             # (H, W2, C)  odd  w
    ws = (we + wo).reshape(H2, 2, W2, Cout)                        # h -> (h2, parity)
    tok = (0.25 * (ws[:, 0] + ws[:, 1])).reshape(H2 * W2, Cout)    # (N, C) tokens

    # --- LayerNorm over channels (eps = 1e-5, torch default).
    mean = jnp.mean(tok, axis=-1, keepdims=True)
    var = jnp.mean((tok - mean) * (tok - mean), axis=-1, keepdims=True)
    tokn = (tok - mean) * jax.lax.rsqrt(var + 1e-5) * lnw_ref[...] + lnb_ref[...]

    # --- Linear(C -> Dout) + GELU, written straight to the output block.
    lin = jnp.dot(tokn, fcw_ref[...], preferred_element_type=jnp.float32)
    lin = lin + fcb_ref[...]
    out_ref[...] = _gelu_exact(lin).astype(out_ref.dtype)


# -----------------------------------------------------------------------------
# Wrapper: one pallas_call over the batch
# -----------------------------------------------------------------------------
def model_forward_impl(params, x_nchw):
    B, Cin, H, W = x_nchw.shape
    Cout = params["conv_w"].shape[0]          # 8
    Dout = params["fc_w"].shape[0]            # 32
    N = (H // 2) * (W // 2)

    # Layout glue (one tiny XLA op each; done once): NCHW -> padded NHWC,
    # and repack weights so the kernel's K ordering matches torch layout.
    xpad = jnp.pad(jnp.transpose(x_nchw, (0, 2, 3, 1)),
                   ((0, 0), (1, 1), (1, 1), (0, 0)))                    # (B,H+2,W+2,Cin)
    conv_w = jnp.transpose(params["conv_w"], (2, 3, 1, 0)).reshape(9, Cin, Cout)
    conv_b = params["conv_b"].reshape(1, Cout)
    ln_w = params["ln_w"].reshape(1, Cout)
    ln_b = params["ln_b"].reshape(1, Cout)
    fc_w = params["fc_w"].T                                             # (Cout, Dout)
    fc_b = params["fc_b"].reshape(1, Dout)

    return pl.pallas_call(
        fused_forward_kernel,
        out_shape=jax.ShapeDtypeStruct((B, N, Dout), jnp.float32),
        grid=(B,),
        in_specs=[
            pl.BlockSpec((None, H + 2, W + 2, Cin), lambda b: (b, 0, 0, 0)),
            pl.BlockSpec((9, Cin, Cout), lambda b: (0, 0, 0)),
            pl.BlockSpec((1, Cout), lambda b: (0, 0)),
            pl.BlockSpec((1, Cout), lambda b: (0, 0)),
            pl.BlockSpec((1, Cout), lambda b: (0, 0)),
            pl.BlockSpec((Cout, Dout), lambda b: (0, 0)),
            pl.BlockSpec((1, Dout), lambda b: (0, 0)),
        ],
        out_specs=pl.BlockSpec((None, N, Dout), lambda b: (b, 0, 0)),
        scratch_shapes=[pltpu.VMEM((H, W, Cout), jnp.float32)],
        compiler_params=pltpu.CompilerParams(
            dimension_semantics=("parallel",)),
    )(xpad, conv_w, conv_b, ln_w, ln_b, fc_w, fc_b)


model_forward = jax.jit(model_forward_impl)


# -----------------------------------------------------------------------------
# Synthetic model params + ProfileConv hook bookkeeping (host-side glue)
# -----------------------------------------------------------------------------
def init_params():
    k = jax.random.PRNGKey(0)
    k1, k2, k3, k4 = jax.random.split(k, 4)
    return {
        "conv_w": 0.1 * jax.random.normal(k1, (8, 4, 3, 3), jnp.float32),  # (out,in,kh,kw)
        "conv_b": 0.1 * jax.random.normal(k2, (8,), jnp.float32),
        "ln_w": jnp.ones((8,), jnp.float32),
        "ln_b": jnp.zeros((8,), jnp.float32),
        "fc_w": 0.1 * jax.random.normal(k3, (32, 8), jnp.float32),         # torch (out,in)
        "fc_b": 0.1 * jax.random.normal(k4, (32,), jnp.float32),
    }


def profile_conv_forward(params, x_nchw):
    """Replicates ProfileConv.forward: run the wrapped model (fused Pallas
    kernel), then return the (macs, params) lists the forward hooks would
    accumulate.  Formulas are copied verbatim from the PyTorch hooks,
    including their quirks (Conv2d 'bias' counted as weight.size(1)=Cin;
    GELU hook counting only size(1)*size(2))."""
    out = model_forward(params, x_nchw)          # the actual forward (Pallas)

    B, Cin, H, W = x_nchw.shape
    Cout = params["conv_w"].shape[0]             # 8
    Dout = params["fc_w"].shape[0]               # 32
    H2, W2 = H // 2, W // 2
    N = H2 * W2
    kk = params["conv_w"].shape[-1]              # 3

    macs, pcount = [], []
    # hook_conv: output (B, Cout, H, W), groups = 1
    macs.append(Cout * H * W * kk * kk * Cin / 1)
    pcount.append(Cout * Cin * kk * kk + Cin)    # hook uses weight.size(1) for "bias"
    # hook_gelu (after conv): output[0] is 3-D -> else branch: size(1)*size(2)
    macs.append(Cout * H)
    # hook_avgpool: output (B, Cout, H2, W2), kernel_size = 2
    macs.append(Cout * H2 * W2 * 2 * 2)
    # hook_layernorm: input (B, N, Cout)
    macs.append(2 * N * Cout)
    pcount.append(Cout + Cout)
    # hook_linear: input (B, N, Cout) is 3-D -> include input.size(-2) = N
    macs.append(Dout * Cout * N)
    pcount.append(Dout * Cout + Dout)
    # hook_gelu (after linear): output[0] is 2-D -> else branch: size(1)*size(2)
    macs.append(N * Dout)

    return (macs, pcount), out


# -----------------------------------------------------------------------------
# Pure-JAX reference (no Pallas) for numeric verification
# -----------------------------------------------------------------------------
def reference_forward(params, x_nchw):
    hp = jax.lax.Precision.HIGHEST
    y = jax.lax.conv_general_dilated(
        x_nchw, params["conv_w"], window_strides=(1, 1), padding="SAME",
        dimension_numbers=("NCHW", "OIHW", "NCHW"), precision=hp)
    y = y + params["conv_b"][None, :, None, None]
    y = jax.nn.gelu(y, approximate=False)
    B, C, H, W = y.shape
    y = y.reshape(B, C, H // 2, 2, W // 2, 2).mean(axis=(3, 5))
    tok = jnp.transpose(y.reshape(B, C, -1), (0, 2, 1))          # (B, N, C)
    mu = tok.mean(-1, keepdims=True)
    var = ((tok - mu) ** 2).mean(-1, keepdims=True)
    tok = (tok - mu) * jax.lax.rsqrt(var + 1e-5) * params["ln_w"] + params["ln_b"]
    lin = jnp.einsum("bnc,dc->bnd", tok, params["fc_w"], precision=hp) + params["fc_b"]
    return jax.nn.gelu(lin, approximate=False)


if __name__ == "__main__":
    params = init_params()
    x = jax.random.normal(jax.random.PRNGKey(0), (2, 4, 16, 16), jnp.float32)  # NCHW

    (macs, pcnt), out = profile_conv_forward(params, x)
    jax.block_until_ready(out)

    ref = reference_forward(params, x)
    max_err = float(jnp.max(jnp.abs(out - ref)))
    assert max_err < 5e-3, f"fused Pallas kernel mismatch vs reference: {max_err}"

    assert len(macs) == 6 and len(pcnt) == 3

    print("KERNEL_OK")
</pallas_src>

<mosaic_0001>
module attributes {stable_mosaic.version = 11 : i64} {
  func.func @fused_forward_kernel(%arg0: i32, %arg1: memref<1x18x18x4xf32, #tpu.memory_space<vmem>>, %arg2: memref<9x4x8xf32, #tpu.memory_space<vmem>>, %arg3: memref<1x8xf32, #tpu.memory_space<vmem>>, %arg4: memref<1x8xf32, #tpu.memory_space<vmem>>, %arg5: memref<1x8xf32, #tpu.memory_space<vmem>>, %arg6: memref<8x32xf32, #tpu.memory_space<vmem>>, %arg7: memref<1x32xf32, #tpu.memory_space<vmem>>, %arg8: memref<1x64x32xf32, #tpu.memory_space<vmem>>, %arg9: memref<16x16x8xf32, #tpu.memory_space<vmem>>) attributes {dimension_semantics = [#tpu.dimension_semantics<parallel>], iteration_bounds = array<i64: 2>, scalar_prefetch = 0 : i64, scratch_operands = 1 : i64, tpu.core_type = #tpu.core_type<tc>, window_params = [{transform_indices = @transform_0, window_bounds = array<i64: 1, 18, 18, 4>}, {pipeline_mode = #tpu.pipeline_mode<synchronous>, transform_indices = @transform_1, window_bounds = array<i64: 9, 4, 8>}, {pipeline_mode = #tpu.pipeline_mode<synchronous>, transform_indices = @transform_2, window_bounds = array<i64: 1, 8>}, {pipeline_mode = #tpu.pipeline_mode<synchronous>, transform_indices = @transform_3, window_bounds = array<i64: 1, 8>}, {pipeline_mode = #tpu.pipeline_mode<synchronous>, transform_indices = @transform_4, window_bounds = array<i64: 1, 8>}, {pipeline_mode = #tpu.pipeline_mode<synchronous>, transform_indices = @transform_5, window_bounds = array<i64: 8, 32>}, {pipeline_mode = #tpu.pipeline_mode<synchronous>, transform_indices = @transform_6, window_bounds = array<i64: 1, 32>}, {transform_indices = @transform_7, window_bounds = array<i64: 1, 64, 32>}]} {
    %cst = arith.constant 0.000000e+00 : f32
    %0 = vector.broadcast %cst : f32 to vector<256x8xf32>
    %c0 = arith.constant 0 : index
    %c0_0 = arith.constant 0 : index
    %c0_1 = arith.constant 0 : index
    %c0_2 = arith.constant 0 : index
    %1 = vector.load %arg1[%c0, %c0_0, %c0_1, %c0_2] : memref<1x18x18x4xf32, #tpu.memory_space<vmem>>, vector<1x16x16x4xf32>
    %2 = vector.shape_cast %1 : vector<1x16x16x4xf32> to vector<16x16x4xf32>
    %3 = vector.shape_cast %2 : vector<16x16x4xf32> to vector<256x4xf32>
    %c0_3 = arith.constant 0 : index
    %c0_4 = arith.constant 0 : index
    %c0_5 = arith.constant 0 : index
    %4 = vector.load %arg2[%c0_3, %c0_4, %c0_5] : memref<9x4x8xf32, #tpu.memory_space<vmem>>, vector<1x4x8xf32>
    %5 = vector.shape_cast %4 : vector<1x4x8xf32> to vector<4x8xf32>
    %cst_6 = arith.constant dense<0.000000e+00> : vector<256x8xf32>
    %6 = tpu.matmul %3, %5, %cst_6 {dimension_numbers = #tpu.dot_dimension_numbers<[1], [0], [0], [1], [0, 0, 1, 1], [], []>} : vector<256x4xf32>, vector<4x8xf32>, vector<256x8xf32> -> vector<256x8xf32>
    %7 = arith.addf %0, %6 : vector<256x8xf32>
    %c0_7 = arith.constant 0 : index
    %c0_8 = arith.constant 0 : index
    %c1 = arith.constant 1 : index
    %c0_9 = arith.constant 0 : index
    %8 = vector.load %arg1[%c0_7, %c0_8, %c1, %c0_9] : memref<1x18x18x4xf32, #tpu.memory_space<vmem>>, vector<1x16x16x4xf32>
    %9 = vector.shape_cast %8 : vector<1x16x16x4xf32> to vector<16x16x4xf32>
    %10 = vector.shape_cast %9 : vector<16x16x4xf32> to vector<256x4xf32>
    %c1_10 = arith.constant 1 : index
    %c0_11 = arith.constant 0 : index
    %c0_12 = arith.constant 0 : index
    %11 = vector.load %arg2[%c1_10, %c0_11, %c0_12] : memref<9x4x8xf32, #tpu.memory_space<vmem>>, vector<1x4x8xf32>
    %12 = vector.shape_cast %11 : vector<1x4x8xf32> to vector<4x8xf32>
    %cst_13 = arith.constant dense<0.000000e+00> : vector<256x8xf32>
    %13 = tpu.matmul %10, %12, %cst_13 {dimension_numbers = #tpu.dot_dimension_numbers<[1], [0], [0], [1], [0, 0, 1, 1], [], []>} : vector<256x4xf32>, vector<4x8xf32>, vector<256x8xf32> -> vector<256x8xf32>
    %14 = arith.addf %7, %13 : vector<256x8xf32>
    %c0_14 = arith.constant 0 : index
    %c0_15 = arith.constant 0 : index
    %c2 = arith.constant 2 : index
    %c0_16 = arith.constant 0 : index
    %15 = vector.load %arg1[%c0_14, %c0_15, %c2, %c0_16] : memref<1x18x18x4xf32, #tpu.memory_space<vmem>>, vector<1x16x16x4xf32>
    %16 = vector.shape_cast %15 : vector<1x16x16x4xf32> to vector<16x16x4xf32>
    %17 = vector.shape_cast %16 : vector<16x16x4xf32> to vector<256x4xf32>
    %c2_17 = arith.constant 2 : index
    %c0_18 = arith.constant 0 : index
    %c0_19 = arith.constant 0 : index
    %18 = vector.load %arg2[%c2_17, %c0_18, %c0_19] : memref<9x4x8xf32, #tpu.memory_space<vmem>>, vector<1x4x8xf32>
    %19 = vector.shape_cast %18 : vector<1x4x8xf32> to vector<4x8xf32>
    %cst_20 = arith.constant dense<0.000000e+00> : vector<256x8xf32>
    %20 = tpu.matmul %17, %19, %cst_20 {dimension_numbers = #tpu.dot_dimension_numbers<[1], [0], [0], [1], [0, 0, 1, 1], [], []>} : vector<256x4xf32>, vector<4x8xf32>, vector<256x8xf32> -> vector<256x8xf32>
    %21 = arith.addf %14, %20 : vector<256x8xf32>
    %c0_21 = arith.constant 0 : index
    %c1_22 = arith.constant 1 : index
    %c0_23 = arith.constant 0 : index
    %c0_24 = arith.constant 0 : index
    %22 = vector.load %arg1[%c0_21, %c1_22, %c0_23, %c0_24] : memref<1x18x18x4xf32, #tpu.memory_space<vmem>>, vector<1x16x16x4xf32>
    %23 = vector.shape_cast %22 : vector<1x16x16x4xf32> to vector<16x16x4xf32>
    %24 = vector.shape_cast %23 : vector<16x16x4xf32> to vector<256x4xf32>
    %c3 = arith.constant 3 : index
    %c0_25 = arith.constant 0 : index
    %c0_26 = arith.constant 0 : index
    %25 = vector.load %arg2[%c3, %c0_25, %c0_26] : memref<9x4x8xf32, #tpu.memory_space<vmem>>, vector<1x4x8xf32>
    %26 = vector.shape_cast %25 : vector<1x4x8xf32> to vector<4x8xf32>
    %cst_27 = arith.constant dense<0.000000e+00> : vector<256x8xf32>
    %27 = tpu.matmul %24, %26, %cst_27 {dimension_numbers = #tpu.dot_dimension_numbers<[1], [0], [0], [1], [0, 0, 1, 1], [], []>} : vector<256x4xf32>, vector<4x8xf32>, vector<256x8xf32> -> vector<256x8xf32>
    %28 = arith.addf %21, %27 : vector<256x8xf32>
    %c0_28 = arith.constant 0 : index
    %c1_29 = arith.constant 1 : index
    %c1_30 = arith.constant 1 : index
    %c0_31 = arith.constant 0 : index
    %29 = vector.load %arg1[%c0_28, %c1_29, %c1_30, %c0_31] : memref<1x18x18x4xf32, #tpu.memory_space<vmem>>, vector<1x16x16x4xf32>
    %30 = vector.shape_cast %29 : vector<1x16x16x4xf32> to vector<16x16x4xf32>
    %31 = vector.shape_cast %30 : vector<16x16x4xf32> to vector<256x4xf32>
    %c4 = arith.constant 4 : index
    %c0_32 = arith.constant 0 : index
    %c0_33 = arith.constant 0 : index
    %32 = vector.load %arg2[%c4, %c0_32, %c0_33] : memref<9x4x8xf32, #tpu.memory_space<vmem>>, vector<1x4x8xf32>
    %33 = vector.shape_cast %32 : vector<1x4x8xf32> to vector<4x8xf32>
    %cst_34 = arith.constant dense<0.000000e+00> : vector<256x8xf32>
    %34 = tpu.matmul %31, %33, %cst_34 {dimension_numbers = #tpu.dot_dimension_numbers<[1], [0], [0], [1], [0, 0, 1, 1], [], []>} : vector<256x4xf32>, vector<4x8xf32>, vector<256x8xf32> -> vector<256x8xf32>
    %35 = arith.addf %28, %34 : vector<256x8xf32>
    %c0_35 = arith.constant 0 : index
    %c1_36 = arith.constant 1 : index
    %c2_37 = arith.constant 2 : index
    %c0_38 = arith.constant 0 : index
    %36 = vector.load %arg1[%c0_35, %c1_36, %c2_37, %c0_38] : memref<1x18x18x4xf32, #tpu.memory_space<vmem>>, vector<1x16x16x4xf32>
    %37 = vector.shape_cast %36 : vector<1x16x16x4xf32> to vector<16x16x4xf32>
    %38 = vector.shape_cast %37 : vector<16x16x4xf32> to vector<256x4xf32>
    %c5 = arith.constant 5 : index
    %c0_39 = arith.constant 0 : index
    %c0_40 = arith.constant 0 : index
    %39 = vector.load %arg2[%c5, %c0_39, %c0_40] : memref<9x4x8xf32, #tpu.memory_space<vmem>>, vector<1x4x8xf32>
    %40 = vector.shape_cast %39 : vector<1x4x8xf32> to vector<4x8xf32>
    %cst_41 = arith.constant dense<0.000000e+00> : vector<256x8xf32>
    %41 = tpu.matmul %38, %40, %cst_41 {dimension_numbers = #tpu.dot_dimension_numbers<[1], [0], [0], [1], [0, 0, 1, 1], [], []>} : vector<256x4xf32>, vector<4x8xf32>, vector<256x8xf32> -> vector<256x8xf32>
    %42 = arith.addf %35, %41 : vector<256x8xf32>
    %c0_42 = arith.constant 0 : index
    %c2_43 = arith.constant 2 : index
    %c0_44 = arith.constant 0 : index
    %c0_45 = arith.constant 0 : index
    %43 = vector.load %arg1[%c0_42, %c2_43, %c0_44, %c0_45] : memref<1x18x18x4xf32, #tpu.memory_space<vmem>>, vector<1x16x16x4xf32>
    %44 = vector.shape_cast %43 : vector<1x16x16x4xf32> to vector<16x16x4xf32>
    %45 = vector.shape_cast %44 : vector<16x16x4xf32> to vector<256x4xf32>
    %c6 = arith.constant 6 : index
    %c0_46 = arith.constant 0 : index
    %c0_47 = arith.constant 0 : index
    %46 = vector.load %arg2[%c6, %c0_46, %c0_47] : memref<9x4x8xf32, #tpu.memory_space<vmem>>, vector<1x4x8xf32>
    %47 = vector.shape_cast %46 : vector<1x4x8xf32> to vector<4x8xf32>
    %cst_48 = arith.constant dense<0.000000e+00> : vector<256x8xf32>
    %48 = tpu.matmul %45, %47, %cst_48 {dimension_numbers = #tpu.dot_dimension_numbers<[1], [0], [0], [1], [0, 0, 1, 1], [], []>} : vector<256x4xf32>, vector<4x8xf32>, vector<256x8xf32> -> vector<256x8xf32>
    %49 = arith.addf %42, %48 : vector<256x8xf32>
    %c0_49 = arith.constant 0 : index
    %c2_50 = arith.constant 2 : index
    %c1_51 = arith.constant 1 : index
    %c0_52 = arith.constant 0 : index
    %50 = vector.load %arg1[%c0_49, %c2_50, %c1_51, %c0_52] : memref<1x18x18x4xf32, #tpu.memory_space<vmem>>, vector<1x16x16x4xf32>
    %51 = vector.shape_cast %50 : vector<1x16x16x4xf32> to vector<16x16x4xf32>
    %52 = vector.shape_cast %51 : vector<16x16x4xf32> to vector<256x4xf32>
    %c7 = arith.constant 7 : index
    %c0_53 = arith.constant 0 : index
    %c0_54 = arith.constant 0 : index
    %53 = vector.load %arg2[%c7, %c0_53, %c0_54] : memref<9x4x8xf32, #tpu.memory_space<vmem>>, vector<1x4x8xf32>
    %54 = vector.shape_cast %53 : vector<1x4x8xf32> to vector<4x8xf32>
    %cst_55 = arith.constant dense<0.000000e+00> : vector<256x8xf32>
    %55 = tpu.matmul %52, %54, %cst_55 {dimension_numbers = #tpu.dot_dimension_numbers<[1], [0], [0], [1], [0, 0, 1, 1], [], []>} : vector<256x4xf32>, vector<4x8xf32>, vector<256x8xf32> -> vector<256x8xf32>
    %56 = arith.addf %49, %55 : vector<256x8xf32>
    %c0_56 = arith.constant 0 : index
    %c2_57 = arith.constant 2 : index
    %c2_58 = arith.constant 2 : index
    %c0_59 = arith.constant 0 : index
    %57 = vector.load %arg1[%c0_56, %c2_57, %c2_58, %c0_59] : memref<1x18x18x4xf32, #tpu.memory_space<vmem>>, vector<1x16x16x4xf32>
    %58 = vector.shape_cast %57 : vector<1x16x16x4xf32> to vector<16x16x4xf32>
    %59 = vector.shape_cast %58 : vector<16x16x4xf32> to vector<256x4xf32>
    %c8 = arith.constant 8 : index
    %c0_60 = arith.constant 0 : index
    %c0_61 = arith.constant 0 : index
    %60 = vector.load %arg2[%c8, %c0_60, %c0_61] : memref<9x4x8xf32, #tpu.memory_space<vmem>>, vector<1x4x8xf32>
    %61 = vector.shape_cast %60 : vector<1x4x8xf32> to vector<4x8xf32>
    %cst_62 = arith.constant dense<0.000000e+00> : vector<256x8xf32>
    %62 = tpu.matmul %59, %61, %cst_62 {dimension_numbers = #tpu.dot_dimension_numbers<[1], [0], [0], [1], [0, 0, 1, 1], [], []>} : vector<256x4xf32>, vector<4x8xf32>, vector<256x8xf32> -> vector<256x8xf32>
    %63 = arith.addf %56, %62 : vector<256x8xf32>
    %c0_63 = arith.constant 0 : index
    %c0_64 = arith.constant 0 : index
    %64 = vector.load %arg3[%c0_63, %c0_64] : memref<1x8xf32, #tpu.memory_space<vmem>>, vector<1x8xf32>
    %65 = vector.broadcast %64 : vector<1x8xf32> to vector<256x8xf32>
    %66 = arith.addf %63, %65 : vector<256x8xf32>
    %cst_65 = arith.constant 5.000000e-01 : f32
    %67 = vector.broadcast %cst_65 : f32 to vector<256x8xf32>
    %68 = arith.mulf %67, %66 : vector<256x8xf32>
    %cst_66 = arith.constant 0.707106769 : f32
    %69 = vector.broadcast %cst_66 : f32 to vector<256x8xf32>
    %70 = arith.mulf %66, %69 : vector<256x8xf32>
    %71 = math.erf %70 : vector<256x8xf32>
    %cst_67 = arith.constant 1.000000e+00 : f32
    %72 = vector.broadcast %cst_67 : f32 to vector<256x8xf32>
    %73 = arith.addf %72, %71 : vector<256x8xf32>
    %74 = arith.mulf %68, %73 : vector<256x8xf32>
    %75 = vector.shape_cast %74 : vector<256x8xf32> to vector<16x16x8xf32>
    %c0_68 = arith.constant 0 : index
    %c0_69 = arith.constant 0 : index
    %c0_70 = arith.constant 0 : index
    %76 = vector.load %arg9[%c0_68, %c0_69, %c0_70] : memref<16x16x8xf32, #tpu.memory_space<vmem>>, vector<16x16x8xf32>
    tpu.vector_store %arg9[%c0_68, %c0_69, %c0_70], %75 {strides = array<i32>} : memref<16x16x8xf32, #tpu.memory_space<vmem>>, vector<16x16x8xf32>,
    %c0_71 = arith.constant 0 : index
    %c0_72 = arith.constant 0 : index
    %c0_73 = arith.constant 0 : index
    %77 = tpu.strided_load %arg9[%c0_71, %c0_72, %c0_73] {strides = array<i32: 1, 2, 1>} : memref<16x16x8xf32, #tpu.memory_space<vmem>>, vector<16x8x8xf32>
    %c0_74 = arith.constant 0 : index
    %c1_75 = arith.constant 1 : index
    %c0_76 = arith.constant 0 : index
    %78 = tpu.strided_load %arg9[%c0_74, %c1_75, %c0_76] {strides = array<i32: 1, 2, 1>} : memref<16x16x8xf32, #tpu.memory_space<vmem>>, vector<16x8x8xf32>
    %79 = arith.addf %77, %78 : vector<16x8x8xf32>
    %80 = vector.shape_cast %79 : vector<16x8x8xf32> to vector<8x2x8x8xf32>
    %81 = vector.extract_strided_slice %80 {offsets = [0, 0, 0, 0], sizes = [8, 1, 8, 8], strides = [1, 1, 1, 1]} : vector<8x2x8x8xf32> to vector<8x1x8x8xf32>
    %82 = vector.shape_cast %81 : vector<8x1x8x8xf32> to vector<8x8x8xf32>
    %83 = vector.extract_strided_slice %80 {offsets = [0, 1, 0, 0], sizes = [8, 1, 8, 8], strides = [1, 1, 1, 1]} : vector<8x2x8x8xf32> to vector<8x1x8x8xf32>
    %84 = vector.shape_cast %83 : vector<8x1x8x8xf32> to vector<8x8x8xf32>
    %85 = arith.addf %82, %84 : vector<8x8x8xf32>
    %cst_77 = arith.constant 2.500000e-01 : f32
    %86 = vector.broadcast %cst_77 : f32 to vector<8x8x8xf32>
    %87 = arith.mulf %86, %85 : vector<8x8x8xf32>
    %88 = vector.shape_cast %87 : vector<8x8x8xf32> to vector<64x8xf32>
    %cst_78 = arith.constant dense<0.000000e+00> : vector<64xf32>
    %89 = vector.multi_reduction <add>, %88, %cst_78 [1] : vector<64x8xf32> to vector<64xf32>
    %90 = vector.shape_cast %89 : vector<64xf32> to vector<64x1xf32>
    %cst_79 = arith.constant 8.000000e+00 : f32
    %91 = vector.broadcast %cst_79 : f32 to vector<64x1xf32>
    %92 = arith.divf %90, %91 : vector<64x1xf32>
    %93 = vector.broadcast %92 : vector<64x1xf32> to vector<64x8xf32>
    %94 = arith.subf %88, %93 : vector<64x8xf32>
    %95 = vector.broadcast %92 : vector<64x1xf32> to vector<64x8xf32>
    %96 = arith.subf %88, %95 : vector<64x8xf32>
    %97 = arith.mulf %94, %96 : vector<64x8xf32>
    %cst_80 = arith.constant dense<0.000000e+00> : vector<64xf32>
    %98 = vector.multi_reduction <add>, %97, %cst_80 [1] : vector<64x8xf32> to vector<64xf32>
    %99 = vector.shape_cast %98 : vector<64xf32> to vector<64x1xf32>
    %cst_81 = arith.constant 8.000000e+00 : f32
    %100 = vector.broadcast %cst_81 : f32 to vector<64x1xf32>
    %101 = arith.divf %99, %100 : vector<64x1xf32>
    %102 = vector.broadcast %92 : vector<64x1xf32> to vector<64x8xf32>
    %103 = arith.subf %88, %102 : vector<64x8xf32>
    %cst_82 = arith.constant 9.99999974E-6 : f32
    %104 = vector.broadcast %cst_82 : f32 to vector<64x1xf32>
    %105 = arith.addf %101, %104 : vector<64x1xf32>
    %106 = math.rsqrt %105 : vector<64x1xf32>
    %107 = vector.broadcast %106 : vector<64x1xf32> to vector<64x8xf32>
    %108 = arith.mulf %103, %107 : vector<64x8xf32>
    %c0_83 = arith.constant 0 : index
    %c0_84 = arith.constant 0 : index
    %109 = vector.load %arg4[%c0_83, %c0_84] : memref<1x8xf32, #tpu.memory_space<vmem>>, vector<1x8xf32>
    %110 = vector.broadcast %109 : vector<1x8xf32> to vector<64x8xf32>
    %111 = arith.mulf %108, %110 : vector<64x8xf32>
    %c0_85 = arith.constant 0 : index
    %c0_86 = arith.constant 0 : index
    %112 = vector.load %arg5[%c0_85, %c0_86] : memref<1x8xf32, #tpu.memory_space<vmem>>, vector<1x8xf32>
    %113 = vector.broadcast %112 : vector<1x8xf32> to vector<64x8xf32>
    %114 = arith.addf %111, %113 : vector<64x8xf32>
    %c0_87 = arith.constant 0 : index
    %c0_88 = arith.constant 0 : index
    %115 = vector.load %arg6[%c0_87, %c0_88] : memref<8x32xf32, #tpu.memory_space<vmem>>, vector<8x32xf32>
    %cst_89 = arith.constant dense<0.000000e+00> : vector<64x32xf32>
    %116 = tpu.matmul %114, %115, %cst_89 {dimension_numbers = #tpu.dot_dimension_numbers<[1], [0], [0], [1], [0, 0, 1, 1], [], []>} : vector<64x8xf32>, vector<8x32xf32>, vector<64x32xf32> -> vector<64x32xf32>
    %c0_90 = arith.constant 0 : index
    %c0_91 = arith.constant 0 : index
    %117 = vector.load %arg7[%c0_90, %c0_91] : memref<1x32xf32, #tpu.memory_space<vmem>>, vector<1x32xf32>
    %118 = vector.broadcast %117 : vector<1x32xf32> to vector<64x32xf32>
    %119 = arith.addf %116, %118 : vector<64x32xf32>
    %cst_92 = arith.constant 5.000000e-01 : f32
    %120 = vector.broadcast %cst_92 : f32 to vector<64x32xf32>
    %121 = arith.mulf %120, %119 : vector<64x32xf32>
    %cst_93 = arith.constant 0.707106769 : f32
    %122 = vector.broadcast %cst_93 : f32 to vector<64x32xf32>
    %123 = arith.mulf %119, %122 : vector<64x32xf32>
    %124 = math.erf %123 : vector<64x32xf32>
    %cst_94 = arith.constant 1.000000e+00 : f32
    %125 = vector.broadcast %cst_94 : f32 to vector<64x32xf32>
    %126 = arith.addf %125, %124 : vector<64x32xf32>
    %127 = arith.mulf %121, %126 : vector<64x32xf32>
    %c0_95 = arith.constant 0 : index
    %c0_96 = arith.constant 0 : index
    %c0_97 = arith.constant 0 : index
    %128 = vector.load %arg8[%c0_95, %c0_96, %c0_97] : memref<1x64x32xf32, #tpu.memory_space<vmem>>, vector<1x64x32xf32>
    %129 = vector.shape_cast %128 : vector<1x64x32xf32> to vector<64x32xf32>
    %130 = vector.shape_cast %127 : vector<64x32xf32> to vector<1x64x32xf32>
    tpu.vector_store %arg8[%c0_95, %c0_96, %c0_97], %130 {strides = array<i32>} : memref<1x64x32xf32, #tpu.memory_space<vmem>>, vector<1x64x32xf32>,
    return
  }
  func.func @transform_0(%arg0: i32) -> (i32, i32, i32, i32) {
    %c0_i32 = arith.constant 0 : i32
    %c0_i32_0 = arith.constant 0 : i32
    %c0_i32_1 = arith.constant 0 : i32
    %c0_i32_2 = arith.constant 0 : i32
    return %arg0, %c0_i32, %c0_i32_0, %c0_i32_1 : i32, i32, i32, i32
  }
  func.func @transform_1(%arg0: i32) -> (i32, i32, i32) {
    %c0_i32 = arith.constant 0 : i32
    %c0_i32_0 = arith.constant 0 : i32
    %c0_i32_1 = arith.constant 0 : i32
    %c0_i32_2 = arith.constant 0 : i32
    return %c0_i32, %c0_i32_0, %c0_i32_1 : i32, i32, i32
  }
  func.func @transform_2(%arg0: i32) -> (i32, i32) {
    %c0_i32 = arith.constant 0 : i32
    %c0_i32_0 = arith.constant 0 : i32
    %c0_i32_1 = arith.constant 0 : i32
    return %c0_i32, %c0_i32_0 : i32, i32
  }
  func.func @transform_3(%arg0: i32) -> (i32, i32) {
    %c0_i32 = arith.constant 0 : i32
    %c0_i32_0 = arith.constant 0 : i32
    %c0_i32_1 = arith.constant 0 : i32
    return %c0_i32, %c0_i32_0 : i32, i32
  }
  func.func @transform_4(%arg0: i32) -> (i32, i32) {
    %c0_i32 = arith.constant 0 : i32
    %c0_i32_0 = arith.constant 0 : i32
    %c0_i32_1 = arith.constant 0 : i32
    return %c0_i32, %c0_i32_0 : i32, i32
  }
  func.func @transform_5(%arg0: i32) -> (i32, i32) {
    %c0_i32 = arith.constant 0 : i32
    %c0_i32_0 = arith.constant 0 : i32
    %c0_i32_1 = arith.constant 0 : i32
    return %c0_i32, %c0_i32_0 : i32, i32
  }
  func.func @transform_6(%arg0: i32) -> (i32, i32) {
    %c0_i32 = arith.constant 0 : i32
    %c0_i32_0 = arith.constant 0 : i32
    %c0_i32_1 = arith.constant 0 : i32
    return %c0_i32, %c0_i32_0 : i32, i32
  }
  func.func @transform_7(%arg0: i32) -> (i32, i32, i32) {
    %c0_i32 = arith.constant 0 : i32
    %c0_i32_0 = arith.constant 0 : i32
    %c0_i32_1 = arith.constant 0 : i32
    return %arg0, %c0_i32, %c0_i32_0 : i32, i32, i32
  }
}

</mosaic_0001>

<bundles_post_ra>
// kernel: model_forward_impl.1
= control target key start
LH: loop header
LB: loop body
LE: loop exit
PB: predicated region body
PF: predicated region fallthrough
CT: control target
= control target key end

     0   :  { %s5876_s24 = smov 0   ;;  %s7665_s0 = inlined_call_operand.vmem [shape: f32[2,18,18,4], index: 0, kind: input, shape index: {}]   ;;  %s7666_s1 = inlined_call_operand.vmem [shape: f32[9,4,8], index: 1, kind: input, shape index: {}]   ;;  %s7667_s2 = inlined_call_operand.vmem [shape: f32[1,8], index: 2, kind: input, shape index: {}]   ;;  %s7668_s3 = inlined_call_operand.vmem [shape: f32[1,8], index: 3, kind: input, shape index: {}]   ;;  %s7669_s4 = inlined_call_operand.vmem [shape: f32[1,8], index: 4, kind: input, shape index: {}]   ;;  %s7670_s5 = inlined_call_operand.vmem [shape: f32[8,32], index: 5, kind: input, shape index: {}]   ;;  %s7671_s6 = inlined_call_operand.vmem [shape: f32[1,32], index: 6, kind: input, shape index: {}]   ;;  %s7672_s7 = inlined_call_operand.vmem [shape: f32[2,64,32], index: 7, kind: output, shape index: {}]  }
   0x1 LB: > { %s4431_s25 = sadd.s32 4294967295, %s5834_s24   ;;  %p4435_p0 = scmp.ge.s32.totalorder %s5834_s24, 1  ;;  %s5834_s24 = sphi %s5876_s24, %s17_s24  }
   0x2   : > { %p237_p1 = scmp.lt.s32.totalorder %s5834_s24, 3 }
   0x4   : > { %p238_p2 = pnand %p4435_p0, %p237_p1 }
   0x6   : > { %241 = sbr.rel (%p238_p2) target bundleno = 1072 (0x430), region = 48 }
   0xb   : > { %v4439_v0 = vld [vmem:[%s7666_s1 + $0x4] sm:$0xf]  ;;  %vm443_vm0 = vcmask 1043456   ;;  %p269_p3 = scmp.lt.s32.totalorder %s4431_s25, 1  ;;  %v4506_v1 = vld [vmem:[%s7666_s1 + $0x8] sm:$0xf] }
   0xc   : > { %5257 = vmatprep.subr.msk.mxu0 %vm443_vm0, %v4439_v0  ;;  %5721 = vmatprep.subr.msk.mxu1 %vm443_vm0, %v4439_v0  ;;  %v311_v2 = vld [vmem:[%s7666_s1] sm:$0xf]  ;;  %vm346_vm1 = vcmask 31744   ;;  %v4572_v9 = vld [vmem:[%s7666_s1 + $0xc] sm:$0xf]  ;;  %vm3927_vm2 = vcmask 64512  }
   0xd   : > { %5258 = vmatpush3.msk.msra.mxu0 %vm443_vm0, %v4439_v0  ;;  %5722 = vmatpush3.msk.msra.mxu1 %vm443_vm0, %v4439_v0  ;;  %s7883_s25 = smov (!%p269_p3, %s4431_s25), 1  ;;  %v5933_v10 = vld [vmem:[%s7666_s1 + $0x10] sm:$0xf]  ;;  %v6057_v35 = vld [vmem:[%s7666_s1 + $0x14] sm:$0xf]  ;;  %vm4367_vm3 = vcmask 261120  }
   0xe   : > { %5357 = vmatprep.subr.msk.mxu0 %vm443_vm0, %v4506_v1  ;;  %5307 = vmatprep.subr.msk.mxu1 %vm443_vm0, %v311_v2  ;;  %s5723_s9 = smul.u32 432, %s7883_s25  ;;  %v6136_v52 = vld [vmem:[%s7666_s1 + $0x18] sm:$0xf]  ;;  %s4950_s14 = sshll.u32 %s7883_s25, 6 }
   0xf   : > { %s7644_s17 = scalar_lea.vmem %s7672_s7, %s4950_s14 }
  0x10   : > { %s5905_s12 = scalar_lea.vmem %s7665_s0, %s5723_s9 }
  0x11   : > { %v312_v3 = vld [vmem:[%s5905_s12 + $0x1] sm:$0xff]  ;;  %v5909_v4 = vld [vmem:[%s5905_s12 + $0xf1] sm:$0xff]  ;;  %v313_v5 = vld [vmem:[%s5905_s12 + $0x9] sm:$0xff] }
  0x12   : > { %5259 = vmatprep.mubr.msk.f32.mxu0 %vm346_vm1, %v312_v3  ;;  %5289 = vmatprep.mubr.msk.f32.mxu1 %vm346_vm1, %v5909_v4  ;;  %v5916_v6 = vld [vmem:[%s5905_s12 + $0xf9] sm:$0xff]  ;;  %v5922_v8 = vld [vmem:[%s5905_s12 + $0x109] sm:$0xff]  ;;  %v5939_v11 = vld [vmem:[%s5905_s12 + $0x21] sm:$0xff] }
  0x13   : > { %v5919_v7 = vld [vmem:[%s5905_s12 + $0x19] sm:$0xff]  ;;  %5260 = vmatmul.mubr.msk.f32.vlgmr.msra.gmra.mxu0 %vm346_vm1, %v313_v5  ;;  %5290 = vmatmul.mubr.msk.f32.vlgmr.msra.gmra.mxu1 %vm346_vm1, %v5916_v6  ;;  %v5942_v12 = vld [vmem:[%s5905_s12 + $0x111] sm:$0xff]  ;;  %v5950_v14 = vld [vmem:[%s5905_s12 + $0x121] sm:$0xff] }
  0x14   : > { %5358 = vmatpush3.msk.msra.mxu0 %vm443_vm0, %v4506_v1  ;;  %5262 = vmatprep.mubr.msk.f32.mxu0 %vm346_vm1, %v5919_v7  ;;  %v5947_v13 = vld [vmem:[%s5905_s12 + $0x31] sm:$0xff]  ;;  %v5965_v15 = vld [vmem:[%s5905_s12 + $0x39] sm:$0xff]  ;;  %v5968_v16 = vld [vmem:[%s5905_s12 + $0x129] sm:$0xff] }
  0x15   : > { %5292 = vmatprep.mubr.msk.f32.mxu1 %vm346_vm1, %v5922_v8  ;;  %5308 = vmatpush3.msk.msra.mxu1 %vm443_vm0, %v311_v2  ;;  %v5971_v17 = vld [vmem:[%s5905_s12 + $0x49] sm:$0xff]  ;;  %v5974_v18 = vld [vmem:[%s5905_s12 + $0x139] sm:$0xff]  ;;  %v5985_v19 = vld [vmem:[%s5905_s12 + $0x51] sm:$0xff] }
  0x16   : > { %5407 = vmatprep.subr.msk.mxu1 %vm443_vm0, %v4572_v9  ;;  %5457 = vmatprep.subr.msk.mxu0 %vm443_vm0, %v5933_v10  ;;  %v5988_v20 = vld [vmem:[%s5905_s12 + $0x141] sm:$0xff]  ;;  %v5994_v22 = vld [vmem:[%s5905_s12 + $0x151] sm:$0xff]  ;;  %v6005_v23 = vld [vmem:[%s5905_s12 + $0x69] sm:$0xff] }
  0x17   : > { %5263 = vmatmul.mubr.msk.f32.gmra.mxu0 %vm346_vm1, %v5939_v11  ;;  %5293 = vmatmul.mubr.msk.f32.gmra.mxu1 %vm346_vm1, %v5942_v12  ;;  %v5991_v21 = vld [vmem:[%s5905_s12 + $0x61] sm:$0xff]  ;;  %7725 = vst [vmem:[#allocation3_spill] sm:$0xff] %v5994_v22  ;;  %v6008_v24 = vld [vmem:[%s5905_s12 + $0x159] sm:$0xff]  ;;  %v6014_v26 = vld [vmem:[%s5905_s12 + $0x169] sm:$0xff] }
  0x18   : > { %5265 = vmatprep.mubr.msk.f32.mxu0 %vm346_vm1, %v5947_v13  ;;  %5295 = vmatprep.mubr.msk.f32.mxu1 %vm346_vm1, %v5950_v14  ;;  %7726 = vst [vmem:[#allocation4_spill] sm:$0xff] %v6008_v24  ;;  %v6011_v25 = vld [vmem:[%s5905_s12 + $0x79] sm:$0xff]  ;;  %7727 = vst [vmem:[#allocation5_spill] sm:$0xff] %v6014_v26  ;;  %v6025_v27 = vld [vmem:[%s5905_s12 + $0x81] sm:$0xff] }
  0x19   : > { %v6028_v28 = vld [vmem:[%s5905_s12 + $0x171] sm:$0xff]  ;;  %v279_v30 = vld [vmem:[%s5905_s12] sm:$0xff]  ;;  %v280_v32 = vld [vmem:[%s5905_s12 + $0x8] sm:$0xff] }
  0x1a   : > { %7728 = vst [vmem:[#allocation6_spill] sm:$0xff] %v6028_v28  ;;  %v6031_v29 = vld [vmem:[%s5905_s12 + $0x91] sm:$0xff]  ;;  %v6042_v31 = vld [vmem:[%s5905_s12 + $0x99] sm:$0xff]  ;;  %v6046_v33 = vld [vmem:[%s5905_s12 + $0xa9] sm:$0xff] }
  0x1b   : > { %5266 = vmatmul.mubr.msk.f32.gmra.mxu0 %vm346_vm1, %v5965_v15  ;;  %5296 = vmatmul.mubr.msk.f32.gmra.mxu1 %vm346_vm1, %v5968_v16  ;;  %v6049_v34 = vld [vmem:[%s5905_s12 + $0x18] sm:$0xff]  ;;  %v6067_v37 = vld [vmem:[%s5905_s12 + $0x20] sm:$0xff]  ;;  %v6073_v39 = vld [vmem:[%s5905_s12 + $0x30] sm:$0xff] }
  0x1c   : > { %5268 = vmatprep.mubr.msk.f32.mxu0 %vm346_vm1, %v5971_v17  ;;  %5298 = vmatprep.mubr.msk.f32.mxu1 %vm346_vm1, %v5974_v18  ;;  %v6064_v36 = vld [vmem:[%s5905_s12 + $0xb1] sm:$0xff]  ;;  %v6070_v38 = vld [vmem:[%s5905_s12 + $0xc1] sm:$0xff]  ;;  %v6087_v40 = vld [vmem:[%s5905_s12 + $0xc9] sm:$0xff] }
  0x1d   : > { %v6090_v41 = vld [vmem:[%s5905_s12 + $0x38] sm:$0xff]  ;;  %v6096_v43 = vld [vmem:[%s5905_s12 + $0x48] sm:$0xff]  ;;  %v6110_v45 = vld [vmem:[%s5905_s12 + $0x50] sm:$0xff] }
  0x1e   : > { %v6093_v42 = vld [vmem:[%s5905_s12 + $0xd9] sm:$0xff]  ;;  %v6107_v44 = vld [vmem:[%s5905_s12 + $0xe1] sm:$0xff]  ;;  %v997_v49 = vld [vmem:[%s5905_s12 + $0xa] sm:$0xff] }
  0x1f   : > { %5269 = vmatmul.mubr.msk.f32.gmra.mxu0 %vm346_vm1, %v5985_v19  ;;  %5299 = vmatmul.mubr.msk.f32.gmra.mxu1 %vm346_vm1, %v5988_v20  ;;  %v6113_v46 = vld [vmem:[%s5905_s12 + $0x60] sm:$0xff]  ;;  %v6124_v48 = vld [vmem:[%s5905_s12 + $0x68] sm:$0xff]  ;;  %v6128_v50 = vld [vmem:[%s5905_s12 + $0x78] sm:$0xff] }
  0x20   : > { %5271 = vmatprep.mubr.msk.f32.mxu0 %vm346_vm1, %v5991_v21  ;;  %5301 = vmatprep.mubr.msk.f32.mxu1 %vm346_vm1, %v5994_v22  ;;  %v996_v47 = vld [vmem:[%s5905_s12 + $0x2] sm:$0xff]  ;;  %v6131_v51 = vld [vmem:[%s5905_s12 + $0x1a] sm:$0xff]  ;;  %v6154_v55 = vld [vmem:[%s5905_s12 + $0x90] sm:$0xff] }
  0x21   : > { %v6146_v53 = vld [vmem:[%s5905_s12 + $0x80] sm:$0xff]  ;;  %v6157_v56 = vld [vmem:[%s5905_s12 + $0x32] sm:$0xff]  ;;  %v6176_v59 = vld [vmem:[%s5905_s12 + $0xa8] sm:$0xff] }
  0x22   : > { %v6149_v54 = vld [vmem:[%s5905_s12 + $0x22] sm:$0xff]  ;;  %7729 = vst [vmem:[#allocation7_spill] sm:$0xff] %v6157_v56  ;;  %v6170_v57 = vld [vmem:[%s5905_s12 + $0x98] sm:$0xff]  ;;  %v6179_v60 = vld [vmem:[%s5905_s12 + $0x4a] sm:$0xff] }
  0x23   : > { %5272 = vmatmul.mubr.msk.f32.gmra.mxu0 %vm346_vm1, %v6005_v23  ;;  %5302 = vmatmul.mubr.msk.f32.gmra.mxu1 %vm346_vm1, %v6008_v24  ;;  %v6173_v58 = vld [vmem:[%s5905_s12 + $0x3a] sm:$0xff]  ;;  %7731 = vst [vmem:[#allocation9_spill] sm:$0xff] %v6179_v60  ;;  %v6190_v61 = vld [vmem:[%s5905_s12 + $0xb0] sm:$0xff]  ;;  %v6199_v0 = vld [vmem:[%s5905_s12 + $0x62] sm:$0xff] }
  0x24   : > { %5274 = vmatprep.mubr.msk.f32.mxu0 %vm346_vm1, %v6011_v25  ;;  %5304 = vmatprep.mubr.msk.f32.mxu1 %vm346_vm1, %v6014_v26  ;;  %7730 = vst [vmem:[#allocation8_spill] sm:$0xff] %v6173_v58  ;;  %v6193_v62 = vld [vmem:[%s5905_s12 + $0x52] sm:$0xff]  ;;  %v6196_v63 = vld [vmem:[%s5905_s12 + $0xc0] sm:$0xff]  ;;  %7733 = vst [vmem:[#allocation11_spill] sm:$0xff] %v6199_v0 }
  0x25   : > { %7732 = vst [vmem:[#allocation10_spill] sm:$0xff] %v6193_v62  ;;  %v6210_v1 = vld [vmem:[%s5905_s12 + $0xc8] sm:$0xff]  ;;  %v6216_v3 = vld [vmem:[%s5905_s12 + $0xd8] sm:$0xff]  ;;  %v6316_v26 = vld [vmem:[%s5905_s12 + $0x150] sm:$0xff] }
  0x26   : > { %v6213_v2 = vld [vmem:[%s5905_s12 + $0x6a] sm:$0xff]  ;;  %v6219_v5 = vld [vmem:[%s5905_s12 + $0x7a] sm:$0xff]  ;;  %v6356_v22 = vld [vmem:[%s5905_s12 + $0x122] sm:$0xff] }
  0x27   : > { %5275 = vmatmul.mubr.msk.f32.gmra.mxu0 %vm346_vm1, %v6025_v27  ;;  %5305 = vmatmul.mubr.msk.f32.gmra.mxu1 %vm346_vm1, %v6028_v28  ;;  %7734 = vst [vmem:[#allocation12_spill] sm:$0xff] %v6213_v2  ;;  %7735 = vst [vmem:[#allocation13_spill] sm:$0xff] %v6219_v5  ;;  %v6296_v28 = vld [vmem:[%s5905_s12 + $0x138] sm:$0xff]  ;;  %v6336_v24 = vld [vmem:[%s5905_s12 + $0x168] sm:$0xff] }
  0x28   : > { %5277 = vmatprep.mubr.msk.f32.mxu0 %vm346_vm1, %v6031_v29  ;;  %5309 = vmatprep.mubr.msk.f32.mxu1 %vm346_vm1, %v279_v30  ;;  %v6236_v30 = vld [vmem:[%s5905_s12 + $0xf0] sm:$0xff]  ;;  %7749 = vst [vmem:[#allocation27_spill] sm:$0xff] %v6356_v22 }
  0x2b   : > { %5278 = vmatmul.mubr.msk.f32.gmra.mxu0 %vm346_vm1, %v6042_v31  ;;  %5310 = vmatmul.mubr.msk.f32.vlgmr.msra.gmra.mxu1 %vm346_vm1, %v280_v32  ;;  %v6239_v32 = vld [vmem:[%s5905_s12 + $0x92] sm:$0xff] }
  0x2c   : > { %5280 = vmatprep.mubr.msk.f32.mxu0 %vm346_vm1, %v6046_v33  ;;  %5312 = vmatprep.mubr.msk.f32.mxu1 %vm346_vm1, %v6049_v34  ;;  %7737 = vst [vmem:[#allocation15_spill] sm:$0xff] %v6239_v32 }
  0x2d   : > { %5408 = vmatpush3.msk.msra.mxu1 %vm443_vm0, %v4572_v9  ;;  %v6230_v9 = vld [vmem:[%s5905_s12 + $0xe0] sm:$0xff] }
  0x2e   : > { %5507 = vmatprep.subr.msk.mxu1 %vm443_vm0, %v6057_v35 }
  0x2f   : > { %5281 = vmatmul.mubr.msk.f32.gmra.mxu0 %vm346_vm1, %v6064_v36  ;;  %5313 = vmatmul.mubr.msk.f32.gmra.mxu1 %vm346_vm1, %v6067_v37 }
  0x30   : > { %5283 = vmatprep.mubr.msk.f32.mxu0 %vm346_vm1, %v6070_v38  ;;  %5315 = vmatprep.mubr.msk.f32.mxu1 %vm346_vm1, %v6073_v39 }
  0x33   : > { %5284 = vmatmul.mubr.msk.f32.gmra.mxu0 %vm346_vm1, %v6087_v40  ;;  %5316 = vmatmul.mubr.msk.f32.gmra.mxu1 %vm346_vm1, %v6090_v41 }
  0x34   : > { %5286 = vmatprep.mubr.msk.f32.mxu0 %vm346_vm1, %v6093_v42  ;;  %5318 = vmatprep.mubr.msk.f32.mxu1 %vm346_vm1, %v6096_v43 }
  0x37   : > { %5287 = vmatmul.mubr.msk.f32.gmra.mxu0 %vm346_vm1, %v6107_v44  ;;  %5319 = vmatmul.mubr.msk.f32.gmra.mxu1 %vm346_vm1, %v6110_v45 }
  0x38   : > { %5321 = vmatprep.mubr.msk.f32.mxu1 %vm346_vm1, %v6113_v46  ;;  %5359 = vmatprep.mubr.msk.f32.mxu0 %vm346_vm1, %v996_v47  ;;  %v6250_v47 = vld [vmem:[%s5905_s12 + $0xf8] sm:$0xff] }
  0x3b   : > { %5322 = vmatmul.mubr.msk.f32.gmra.mxu1 %vm346_vm1, %v6124_v48  ;;  %5360 = vmatmul.mubr.msk.f32.vlgmr.msra.gmra.mxu0 %vm346_vm1, %v997_v49  ;;  %v6253_v49 = vld [vmem:[%s5905_s12 + $0x9a] sm:$0xff] }
  0x3c   : > { %5458 = vmatpush3.msk.msra.mxu0 %vm443_vm0, %v5933_v10  ;;  %5324 = vmatprep.mubr.msk.f32.mxu1 %vm346_vm1, %v6128_v50  ;;  %v6233_v10 = vld [vmem:[%s5905_s12 + $0x82] sm:$0xff]  ;;  %7738 = vst [vmem:[#allocation16_spill] sm:$0xff] %v6253_v49 }
  0x3d   : > { %5362 = vmatprep.mubr.msk.f32.mxu0 %vm346_vm1, %v6131_v51  ;;  %5557 = vmatprep.subr.msk.mxu0 %vm443_vm0, %v6136_v52  ;;  %7736 = vst [vmem:[#allocation14_spill] sm:$0xff] %v6233_v10 }
  0x3f   : > { %5325 = vmatmul.mubr.msk.f32.gmra.mxu1 %vm346_vm1, %v6146_v53  ;;  %5363 = vmatmul.mubr.msk.f32.gmra.mxu0 %vm346_vm1, %v6149_v54 }
  0x40   : > { %5327 = vmatprep.mubr.msk.f32.mxu1 %vm346_vm1, %v6154_v55  ;;  %5365 = vmatprep.mubr.msk.f32.mxu0 %vm346_vm1, %v6157_v56  ;;  %v6339_v56 = vld [vmem:[%s5905_s12 + $0x10a] sm:$0xff] }
  0x41   : > { %7747 = vst [vmem:[#allocation25_spill] sm:$0xff] %v6339_v56 }
  0x43   : > { %5328 = vmatmul.mubr.msk.f32.gmra.mxu1 %vm346_vm1, %v6170_v57  ;;  %5366 = vmatmul.mubr.msk.f32.gmra.mxu0 %vm346_vm1, %v6173_v58  ;;  %v6319_v58 = vld [vmem:[%s5905_s12 + $0xf2] sm:$0xff] }
  0x44   : > { %5330 = vmatprep.mubr.msk.f32.mxu1 %vm346_vm1, %v6176_v59  ;;  %5368 = vmatprep.mubr.msk.f32.mxu0 %vm346_vm1, %v6179_v60  ;;  %v6299_v60 = vld [vmem:[%s5905_s12 + $0xda] sm:$0xff]  ;;  %7745 = vst [vmem:[#allocation23_spill] sm:$0xff] %v6319_v58 }
  0x45   : > { %7743 = vst [vmem:[#allocation21_spill] sm:$0xff] %v6299_v60 }
  0x47   : > { %5331 = vmatmul.mubr.msk.f32.gmra.mxu1 %vm346_vm1, %v6190_v61  ;;  %5369 = vmatmul.mubr.msk.f32.gmra.mxu0 %vm346_vm1, %v6193_v62  ;;  %v6279_v62 = vld [vmem:[%s5905_s12 + $0xc2] sm:$0xff] }
  0x48   : > { %5333 = vmatprep.mubr.msk.f32.mxu1 %vm346_vm1, %v6196_v63  ;;  %5371 = vmatprep.mubr.msk.f32.mxu0 %vm346_vm1, %v6199_v0  ;;  %v6276_v0 = vld [vmem:[%s5905_s12 + $0x120] sm:$0xff]  ;;  %7741 = vst [vmem:[#allocation19_spill] sm:$0xff] %v6279_v62 }
  0x4b   : > { %5334 = vmatmul.mubr.msk.f32.gmra.mxu1 %vm346_vm1, %v6210_v1  ;;  %5372 = vmatmul.mubr.msk.f32.gmra.mxu0 %vm346_vm1, %v6213_v2  ;;  %v6259_v2 = vld [vmem:[%s5905_s12 + $0xaa] sm:$0xff] }
  0x4c   : > { %5336 = vmatprep.mubr.msk.f32.mxu1 %vm346_vm1, %v6216_v3  ;;  %5374 = vmatprep.mubr.msk.f32.mxu0 %vm346_vm1, %v6219_v5  ;;  %v6256_v5 = vld [vmem:[%s5905_s12 + $0x108] sm:$0xff]  ;;  %7739 = vst [vmem:[#allocation17_spill] sm:$0xff] %v6259_v2 }
  0x4f   : > { %5337 = vmatmul.mubr.msk.f32.gmra.mxu1 %vm346_vm1, %v6230_v9  ;;  %5375 = vmatmul.mubr.msk.f32.gmra.mxu0 %vm346_vm1, %v6233_v10  ;;  %v6273_v10 = vld [vmem:[%s5905_s12 + $0xb2] sm:$0xff] }
  0x50   : > { %5339 = vmatprep.mubr.msk.f32.mxu1 %vm346_vm1, %v6236_v30  ;;  %5377 = vmatprep.mubr.msk.f32.mxu0 %vm346_vm1, %v6239_v32  ;;  %v6270_v32 = vld [vmem:[%s5905_s12 + $0x110] sm:$0xff]  ;;  %7740 = vst [vmem:[#allocation18_spill] sm:$0xff] %v6273_v10 }
  0x53   : > { %5340 = vmatmul.mubr.msk.f32.gmra.mxu1 %vm346_vm1, %v6250_v47  ;;  %5378 = vmatmul.mubr.msk.f32.gmra.mxu0 %vm346_vm1, %v6253_v49  ;;  %v6293_v49 = vld [vmem:[%s5905_s12 + $0xca] sm:$0xff] }
  0x54   : > { %5342 = vmatprep.mubr.msk.f32.mxu1 %vm346_vm1, %v6256_v5  ;;  %5380 = vmatprep.mubr.msk.f32.mxu0 %vm346_vm1, %v6259_v2  ;;  %v6290_v2 = vld [vmem:[%s5905_s12 + $0x128] sm:$0xff]  ;;  %7742 = vst [vmem:[#allocation20_spill] sm:$0xff] %v6293_v49 }
  0x57   : > { %5343 = vmatmul.mubr.msk.f32.gmra.mxu1 %vm346_vm1, %v6270_v32  ;;  %5381 = vmatmul.mubr.msk.f32.gmra.mxu0 %vm346_vm1, %v6273_v10  ;;  %v6313_v10 = vld [vmem:[%s5905_s12 + $0xe2] sm:$0xff] }
  0x58   : > { %5345 = vmatprep.mubr.msk.f32.mxu1 %vm346_vm1, %v6276_v0  ;;  %5383 = vmatprep.mubr.msk.f32.mxu0 %vm346_vm1, %v6279_v62  ;;  %v6310_v62 = vld [vmem:[%s5905_s12 + $0x140] sm:$0xff]  ;;  %7744 = vst [vmem:[#allocation22_spill] sm:$0xff] %v6313_v10 }
  0x5b   : > { %5346 = vmatmul.mubr.msk.f32.gmra.mxu1 %vm346_vm1, %v6290_v2  ;;  %5384 = vmatmul.mubr.msk.f32.gmra.mxu0 %vm346_vm1, %v6293_v49  ;;  %v6333_v49 = vld [vmem:[%s5905_s12 + $0xfa] sm:$0xff] }
  0x5c   : > { %5348 = vmatprep.mubr.msk.f32.mxu1 %vm346_vm1, %v6296_v28  ;;  %5386 = vmatprep.mubr.msk.f32.mxu0 %vm346_vm1, %v6299_v60  ;;  %v6330_v60 = vld [vmem:[%s5905_s12 + $0x158] sm:$0xff]  ;;  %7746 = vst [vmem:[#allocation24_spill] sm:$0xff] %v6333_v49 }
  0x5f   : > { %5349 = vmatmul.mubr.msk.f32.gmra.mxu1 %vm346_vm1, %v6310_v62  ;;  %5387 = vmatmul.mubr.msk.f32.gmra.mxu0 %vm346_vm1, %v6313_v10  ;;  %v6353_v10 = vld [vmem:[%s5905_s12 + $0x112] sm:$0xff] }
  0x60   : > { %5351 = vmatprep.mubr.msk.f32.mxu1 %vm346_vm1, %v6316_v26  ;;  %5389 = vmatprep.mubr.msk.f32.mxu0 %vm346_vm1, %v6319_v58  ;;  %v6350_v58 = vld [vmem:[%s5905_s12 + $0x170] sm:$0xff]  ;;  %7748 = vst [vmem:[#allocation26_spill] sm:$0xff] %v6353_v10 }
  0x63   : > { %5352 = vmatmul.mubr.msk.f32.gmra.mxu1 %vm346_vm1, %v6330_v60  ;;  %5390 = vmatmul.mubr.msk.f32.gmra.mxu0 %vm346_vm1, %v6333_v49  ;;  %v6370_v49 = vld [vmem:[%s5905_s12 + $0x13a] sm:$0xff] }
  0x64   : > { %5354 = vmatprep.mubr.msk.f32.mxu1 %vm346_vm1, %v6336_v24  ;;  %5392 = vmatprep.mubr.msk.f32.mxu0 %vm346_vm1, %v6339_v56  ;;  %v6367_v56 = vld [vmem:[%s5905_s12 + $0x12a] sm:$0xff]  ;;  %7750 = vst [vmem:[#allocation28_spill] sm:$0xff] %v6370_v49 }
  0x67   : > { %5355 = vmatmul.mubr.msk.f32.gmra.mxu1 %vm346_vm1, %v6350_v58  ;;  %5393 = vmatmul.mubr.msk.f32.gmra.mxu0 %vm346_vm1, %v6353_v10  ;;  %v6379_v10 = vld [vmem:[%s7666_s1 + $0x1c] sm:$0xf] }
  0x68   : > { %5395 = vmatprep.mubr.msk.f32.mxu0 %vm346_vm1, %v6356_v22  ;;  %5409 = vmatprep.mubr.msk.f32.mxu1 %vm346_vm1, %v6049_v34  ;;  %v6386_v34 = vld [vmem:[%s5905_s12 + $0x142] sm:$0xff]  ;;  %v6389_v22 = vld [vmem:[%s5905_s12 + $0x152] sm:$0xff] }
  0x6b   : > { %5396 = vmatmul.mubr.msk.f32.gmra.mxu0 %vm346_vm1, %v6367_v56  ;;  %5410 = vmatmul.mubr.msk.f32.vlgmr.msra.gmra.mxu1 %vm346_vm1, %v6067_v37  ;;  %v6404_v37 = vld [vmem:[%s5905_s12 + $0x15a] sm:$0xff] }
  0x6c   : > { %5398 = vmatprep.mubr.msk.f32.mxu0 %vm346_vm1, %v6370_v49  ;;  %5412 = vmatprep.mubr.msk.f32.mxu1 %vm346_vm1, %v6073_v39  ;;  %v6407_v49 = vld [vmem:[%s5905_s12 + $0x16a] sm:$0xff] }
  0x6d   : > { %5508 = vmatpush3.msk.msra.mxu1 %vm443_vm0, %v6057_v35  ;;  %7751 = vst [vmem:[#allocation29_spill] sm:$0xff] %v6407_v49  ;;  %v6418_v35 = vld [vmem:[%s5905_s12 + $0x172] sm:$0xff] }
  0x6e   : > { %5607 = vmatprep.subr.msk.mxu1 %vm443_vm0, %v6379_v10 }
  0x6f   : > { %5399 = vmatmul.mubr.msk.f32.gmra.mxu0 %vm346_vm1, %v6386_v34  ;;  %5413 = vmatmul.mubr.msk.f32.gmra.mxu1 %vm346_vm1, %v6090_v41 }
  0x70   : > { %5401 = vmatprep.mubr.msk.f32.mxu0 %vm346_vm1, %v6389_v22  ;;  %5415 = vmatprep.mubr.msk.f32.mxu1 %vm346_vm1, %v6096_v43 }
  0x73   : > { %5402 = vmatmul.mubr.msk.f32.gmra.mxu0 %vm346_vm1, %v6404_v37  ;;  %5416 = vmatmul.mubr.msk.f32.gmra.mxu1 %vm346_vm1, %v6110_v45 }
  0x74   : > { %5404 = vmatprep.mubr.msk.f32.mxu0 %vm346_vm1, %v6407_v49  ;;  %5418 = vmatprep.mubr.msk.f32.mxu1 %vm346_vm1, %v6113_v46  ;;  %v6431_v49 = vld [vmem:[%s7666_s1 + $0x20] sm:$0xf] }
  0x77   : > { %5405 = vmatmul.mubr.msk.f32.gmra.mxu0 %vm346_vm1, %v6418_v35  ;;  %5419 = vmatmul.mubr.msk.f32.gmra.mxu1 %vm346_vm1, %v6124_v48 }
  0x78   : > { %5421 = vmatprep.mubr.msk.f32.mxu1 %vm346_vm1, %v6128_v50  ;;  %5459 = vmatprep.mubr.msk.f32.mxu0 %vm346_vm1, %v5919_v7  ;;  %v6518_v7 = vld [vmem:[%s5905_s12 + $0x180] sm:$0xff] }
  0x7b   : > { %5422 = vmatmul.mubr.msk.f32.gmra.mxu1 %vm346_vm1, %v6146_v53  ;;  %5460 = vmatmul.mubr.msk.f32.vlgmr.msra.gmra.mxu0 %vm346_vm1, %v5939_v11  ;;  %v7754_v11 = vld [vmem:[#allocation4_spill] sm:$0xff] }
  0x7c   : > { %5558 = vmatpush3.msk.msra.mxu0 %vm443_vm0, %v6136_v52  ;;  %5424 = vmatprep.mubr.msk.f32.mxu1 %vm346_vm1, %v6154_v55  ;;  %v7761_v52 = vld [vmem:[#allocation11_spill] sm:$0xff] }
  0x7d   : > { %5462 = vmatprep.mubr.msk.f32.mxu0 %vm346_vm1, %v5947_v13  ;;  %5657 = vmatprep.subr.msk.mxu0 %vm443_vm0, %v6431_v49 }
  0x7f   : > { %5425 = vmatmul.mubr.msk.f32.gmra.mxu1 %vm346_vm1, %v6170_v57  ;;  %5463 = vmatmul.mubr.msk.f32.gmra.mxu0 %vm346_vm1, %v5965_v15 }
  0x80   : > { %5427 = vmatprep.mubr.msk.f32.mxu1 %vm346_vm1, %v6176_v59  ;;  %5465 = vmatprep.mubr.msk.f32.mxu0 %vm346_vm1, %v5971_v17 }
  0x83   : > { %5428 = vmatmul.mubr.msk.f32.gmra.mxu1 %vm346_vm1, %v6190_v61  ;;  %5466 = vmatmul.mubr.msk.f32.gmra.mxu0 %vm346_vm1, %v5985_v19 }
  0x84   : > { %5430 = vmatprep.mubr.msk.f32.mxu1 %vm346_vm1, %v6196_v63  ;;  %5468 = vmatprep.mubr.msk.f32.mxu0 %vm346_vm1, %v5991_v21 }
  0x87   : > { %5431 = vmatmul.mubr.msk.f32.gmra.mxu1 %vm346_vm1, %v6210_v1  ;;  %5469 = vmatmul.mubr.msk.f32.gmra.mxu0 %vm346_vm1, %v6005_v23 }
  0x88   : > { %5433 = vmatprep.mubr.msk.f32.mxu1 %vm346_vm1, %v6216_v3  ;;  %5471 = vmatprep.mubr.msk.f32.mxu0 %vm346_vm1, %v6011_v25 }
  0x8b   : > { %5434 = vmatmul.mubr.msk.f32.gmra.mxu1 %vm346_vm1, %v6230_v9  ;;  %5472 = vmatmul.mubr.msk.f32.gmra.mxu0 %vm346_vm1, %v6025_v27 }
  0x8c   : > { %5436 = vmatprep.mubr.msk.f32.mxu1 %vm346_vm1, %v6236_v30  ;;  %5474 = vmatprep.mubr.msk.f32.mxu0 %vm346_vm1, %v6031_v29 }
  0x8f   : > { %5437 = vmatmul.mubr.msk.f32.gmra.mxu1 %vm346_vm1, %v6250_v47  ;;  %5475 = vmatmul.mubr.msk.f32.gmra.mxu0 %vm346_vm1, %v6042_v31 }
  0x90   : > { %5439 = vmatprep.mubr.msk.f32.mxu1 %vm346_vm1, %v6256_v5  ;;  %5477 = vmatprep.mubr.msk.f32.mxu0 %vm346_vm1, %v6046_v33 }
  0x93   : > { %5440 = vmatmul.mubr.msk.f32.gmra.mxu1 %vm346_vm1, %v6270_v32  ;;  %5478 = vmatmul.mubr.msk.f32.gmra.mxu0 %vm346_vm1, %v6064_v36 }
  0x94   : > { %5442 = vmatprep.mubr.msk.f32.mxu1 %vm346_vm1, %v6276_v0  ;;  %5480 = vmatprep.mubr.msk.f32.mxu0 %vm346_vm1, %v6070_v38 }
  0x97   : > { %5443 = vmatmul.mubr.msk.f32.gmra.mxu1 %vm346_vm1, %v6290_v2  ;;  %5481 = vmatmul.mubr.msk.f32.gmra.mxu0 %vm346_vm1, %v6087_v40 }
  0x98   : > { %5445 = vmatprep.mubr.msk.f32.mxu1 %vm346_vm1, %v6296_v28  ;;  %5483 = vmatprep.mubr.msk.f32.mxu0 %vm346_vm1, %v6093_v42 }
  0x9b   : > { %5446 = vmatmul.mubr.msk.f32.gmra.mxu1 %vm346_vm1, %v6310_v62  ;;  %5484 = vmatmul.mubr.msk.f32.gmra.mxu0 %vm346_vm1, %v6107_v44 }
  0x9c   : > { %5448 = vmatprep.mubr.msk.f32.mxu1 %vm346_vm1, %v6316_v26  ;;  %5486 = vmatprep.mubr.msk.f32.mxu0 %vm346_vm1, %v5909_v4  ;;  %v6529_v4 = vld [vmem:[%s5905_s12 + $0x188] sm:$0xff] }
  0x9f   : > { %5449 = vmatmul.mubr.msk.f32.gmra.mxu1 %vm346_vm1, %v6330_v60  ;;  %5487 = vmatmul.mubr.msk.f32.gmra.mxu0 %vm346_vm1, %v5916_v6  ;;  %v7752_v6 = vld [vmem:[#allocation3_spill] sm:$0xff] }
  0xa0   : > { %5451 = vmatprep.mubr.msk.f32.mxu1 %vm346_vm1, %v6336_v24  ;;  %5489 = vmatprep.mubr.msk.f32.mxu0 %vm346_vm1, %v5922_v8  ;;  %v7753_v8 = vld [vmem:[#allocation7_spill] sm:$0xff] }
  0xa3   : > { %5452 = vmatmul.mubr.msk.f32.gmra.mxu1 %vm346_vm1, %v6350_v58  ;;  %5490 = vmatmul.mubr.msk.f32.gmra.mxu0 %vm346_vm1, %v5942_v12  ;;  %v7755_v12 = vld [vmem:[#allocation8_spill] sm:$0xff] }
  0xa4   : > { %5454 = vmatprep.mubr.msk.f32.mxu1 %vm346_vm1, %v6518_v7  ;;  %5492 = vmatprep.mubr.msk.f32.mxu0 %vm346_vm1, %v5950_v14  ;;  %v7756_v14 = vld [vmem:[#allocation5_spill] sm:$0xff] }
  0xa7   : > { %5455 = vmatmul.mubr.msk.f32.gmra.mxu1 %vm346_vm1, %v6529_v4  ;;  %5493 = vmatmul.mubr.msk.f32.gmra.mxu0 %vm346_vm1, %v5968_v16  ;;  %v7757_v16 = vld [vmem:[#allocation9_spill] sm:$0xff] }
  0xa8   : > { %5495 = vmatprep.mubr.msk.f32.mxu0 %vm346_vm1, %v5974_v18  ;;  %5509 = vmatprep.mubr.msk.f32.mxu1 %vm346_vm1, %v6131_v51  ;;  %v6558_v18 = vld [vmem:[%s5905_s12 + $0x181] sm:$0xff]  ;;  %v7760_v51 = vld [vmem:[#allocation10_spill] sm:$0xff] }
  0xa9   : > { %7758 = vst [vmem:[#allocation3_spill] sm:$0xff] %v6558_v18 }
  0xab   : > { %5496 = vmatmul.mubr.msk.f32.gmra.mxu0 %vm346_vm1, %v5988_v20  ;;  %5510 = vmatmul.mubr.msk.f32.vlgmr.msra.gmra.mxu1 %vm346_vm1, %v6149_v54  ;;  %v7759_v20 = vld [vmem:[#allocation6_spill] sm:$0xff]  ;;  %v6569_v54 = vld [vmem:[%s5905_s12 + $0x189] sm:$0xff] }
  0xac   : > { %5498 = vmatprep.mubr.msk.f32.mxu0 %vm346_vm1, %v7752_v6  ;;  %5512 = vmatprep.mubr.msk.f32.mxu1 %vm346_vm1, %v7753_v8  ;;  %7762 = vst [vmem:[#allocation7_spill] sm:$0xff] %v6569_v54  ;;  %v7764_v6 = vld [vmem:[#allocation13_spill] sm:$0xff] }
  0xad   : > { %5608 = vmatpush3.msk.msra.mxu1 %vm443_vm0, %v6379_v10  ;;  %v7763_v10 = vld [vmem:[#allocation12_spill] sm:$0xff] }
  0xaf   : > { %5499 = vmatmul.mubr.msk.f32.gmra.mxu0 %vm346_vm1, %v7754_v11  ;;  %5513 = vmatmul.mubr.msk.f32.gmra.mxu1 %vm346_vm1, %v7755_v12  ;;  %v7765_v11 = vld [vmem:[#allocation14_spill] sm:$0xff] }
  0xb0   : > { %5501 = vmatprep.mubr.msk.f32.mxu0 %vm346_vm1, %v7756_v14  ;;  %5515 = vmatprep.mubr.msk.f32.mxu1 %vm346_vm1, %v7757_v16  ;;  %v7766_v14 = vld [vmem:[#allocation15_spill] sm:$0xff] }
  0xb3   : > { %5502 = vmatmul.mubr.msk.f32.gmra.mxu0 %vm346_vm1, %v7759_v20  ;;  %5516 = vmatmul.mubr.msk.f32.gmra.mxu1 %vm346_vm1, %v7760_v51  ;;  %v7767_v20 = vld [vmem:[#allocation16_spill] sm:$0xff] }
  0xb4   : > { %5504 = vmatprep.mubr.msk.f32.mxu0 %vm346_vm1, %v6558_v18  ;;  %5518 = vmatprep.mubr.msk.f32.mxu1 %vm346_vm1, %v7761_v52 }
  0xb7   : > { %5505 = vmatmul.mubr.msk.f32.gmra.mxu0 %vm346_vm1, %v6569_v54  ;;  %5519 = vmatmul.mubr.msk.f32.gmra.mxu1 %vm346_vm1, %v7763_v10  ;;  %v7777_v54 = vld [vmem:[#allocation26_spill] sm:$0xff] }
  0xb8   : > { %5521 = vmatprep.mubr.msk.f32.mxu1 %vm346_vm1, %v7764_v6  ;;  %5559 = vmatprep.mubr.msk.f32.mxu0 %vm346_vm1, %v6073_v39  ;;  %v7768_v39 = vld [vmem:[#allocation17_spill] sm:$0xff] }
  0xbb   : > { %5522 = vmatmul.mubr.msk.f32.gmra.mxu1 %vm346_vm1, %v7765_v11  ;;  %5560 = vmatmul.mubr.msk.f32.vlgmr.msra.gmra.mxu0 %vm346_vm1, %v6090_v41  ;;  %v7769_v41 = vld [vmem:[#allocation18_spill] sm:$0xff] }
  0xbc   : > { %5658 = vmatpush3.msk.msra.mxu0 %vm443_vm0, %v6431_v49  ;;  %5524 = vmatprep.mubr.msk.f32.mxu1 %vm346_vm1, %v7766_v14  ;;  %v7770_v49 = vld [vmem:[#allocation19_spill] sm:$0xff] }
  0xbd   : > { %5562 = vmatprep.mubr.msk.f32.mxu0 %vm346_vm1, %v6096_v43  ;;  %v7771_v43 = vld [vmem:[#allocation20_spill] sm:$0xff] }
  0xbf   : > { %5525 = vmatmul.mubr.msk.f32.gmra.mxu1 %vm346_vm1, %v7767_v20  ;;  %5563 = vmatmul.mubr.msk.f32.gmra.mxu0 %vm346_vm1, %v6110_v45  ;;  %v7772_v45 = vld [vmem:[#allocation21_spill] sm:$0xff] }
  0xc0   : > { %5527 = vmatprep.mubr.msk.f32.mxu1 %vm346_vm1, %v7768_v39  ;;  %5565 = vmatprep.mubr.msk.f32.mxu0 %vm346_vm1, %v6113_v46  ;;  %v7773_v46 = vld [vmem:[#allocation22_spill] sm:$0xff] }
  0xc3   : > { %5528 = vmatmul.mubr.msk.f32.gmra.mxu1 %vm346_vm1, %v7769_v41  ;;  %5566 = vmatmul.mubr.msk.f32.gmra.mxu0 %vm346_vm1, %v6124_v48  ;;  %v7774_v48 = vld [vmem:[#allocation23_spill] sm:$0xff] }
  0xc4   : > { %5530 = vmatprep.mubr.msk.f32.mxu1 %vm346_vm1, %v7770_v49  ;;  %5568 = vmatprep.mubr.msk.f32.mxu0 %vm346_vm1, %v6128_v50  ;;  %v7775_v50 = vld [vmem:[#allocation24_spill] sm:$0xff] }
  0xc7   : > { %5531 = vmatmul.mubr.msk.f32.gmra.mxu1 %vm346_vm1, %v7771_v43  ;;  %5569 = vmatmul.mubr.msk.f32.gmra.mxu0 %vm346_vm1, %v6146_v53  ;;  %v7776_v53 = vld [vmem:[#allocation25_spill] sm:$0xff] }
  0xc8   : > { %5533 = vmatprep.mubr.msk.f32.mxu1 %vm346_vm1, %v7772_v45  ;;  %5571 = vmatprep.mubr.msk.f32.mxu0 %vm346_vm1, %v6154_v55 }
  0xcb   : > { %5534 = vmatmul.mubr.msk.f32.gmra.mxu1 %vm346_vm1, %v7773_v46  ;;  %5572 = vmatmul.mubr.msk.f32.gmra.mxu0 %vm346_vm1, %v6170_v57 }
  0xcc   : > { %5536 = vmatprep.mubr.msk.f32.mxu1 %vm346_vm1, %v7774_v48  ;;  %5574 = vmatprep.mubr.msk.f32.mxu0 %vm346_vm1, %v6176_v59  ;;  %v7778_v59 = vld [vmem:[#allocation27_spill] sm:$0xff] }
  0xcf   : > { %5537 = vmatmul.mubr.msk.f32.gmra.mxu1 %vm346_vm1, %v7775_v50  ;;  %5575 = vmatmul.mubr.msk.f32.gmra.mxu0 %vm346_vm1, %v6190_v61 }
  0xd0   : > { %5539 = vmatprep.mubr.msk.f32.mxu1 %vm346_vm1, %v7776_v53  ;;  %5577 = vmatprep.mubr.msk.f32.mxu0 %vm346_vm1, %v6196_v63 }
  0xd3   : > { %v5261_v55 = vpop.f32.mrf.mxu0  ;;  %v6629_v57 = vpop.f32.mrf.mxu1  ;;  %5540 = vmatmul.mubr.msk.f32.gmra.mxu1 %vm346_vm1, %v7777_v54  ;;  %5578 = vmatmul.mubr.msk.f32.gmra.mxu0 %vm346_vm1, %v6210_v1  ;;  %v7780_v54 = vld [vmem:[#allocation28_spill] sm:$0xff] }
  0xd4   : > { %5542 = vmatprep.mubr.msk.f32.mxu1 %vm346_vm1, %v7778_v59  ;;  %5580 = vmatprep.mubr.msk.f32.mxu0 %vm346_vm1, %v6216_v3 }
  0xd5   : > { %v513_v61 = vpop.f32.mrf.mxu0  ;;  %v6639_v18 = vpop.f32.mrf.mxu1 }
  0xd6   : > { %7779 = vst [vmem:[#allocation4_spill] sm:$0xff] %v6639_v18 }
  0xd7   : > { %v5264_v53 = vpop.f32.mrf.mxu0  ;;  %v6641_v63 = vpop.f32.mrf.mxu1  ;;  %5543 = vmatmul.mubr.msk.f32.gmra.mxu1 %vm346_vm1, %v6367_v56  ;;  %5581 = vmatmul.mubr.msk.f32.gmra.mxu0 %vm346_vm1, %v6230_v9 }
  0xd8   : > { %5545 = vmatprep.mubr.msk.f32.mxu1 %vm346_vm1, %v7780_v54  ;;  %5583 = vmatprep.mubr.msk.f32.mxu0 %vm346_vm1, %v6236_v30 }
  0xd9   : > { %v523_v1 = vpop.f32.mrf.mxu0  ;;  %v6651_v3 = vpop.f32.mrf.mxu1 }
  0xda   : > { %7781 = vst [vmem:[#allocation8_spill] sm:$0xff] %v6651_v3 }
  0xdb   : > { %v5267_v59 = vpop.f32.mrf.mxu0  ;;  %v6653_v18 = vpop.f32.mrf.mxu1  ;;  %5546 = vmatmul.mubr.msk.f32.gmra.mxu1 %vm346_vm1, %v6386_v34  ;;  %5584 = vmatmul.mubr.msk.f32.gmra.mxu0 %vm346_vm1, %v6250_v47  ;;  %v7783_v47 = vld [vmem:[#allocation29_spill] sm:$0xff]  ;;  %v6678_v34 = vld [vmem:[%s5905_s12 + $0x182] sm:$0xff] }
  0xdc   : > { %5548 = vmatprep.mubr.msk.f32.mxu1 %vm346_vm1, %v6389_v22  ;;  %5586 = vmatprep.mubr.msk.f32.mxu0 %vm346_vm1, %v6256_v5  ;;  %7784 = vst [vmem:[#allocation9_spill] sm:$0xff] %v6678_v34 }
  0xdd   : > { %v533_v56 = vpop.f32.mrf.mxu0  ;;  %v6663_v9 = vpop.f32.mrf.mxu1 }
  0xdf   : > { %v5270_v30 = vpop.f32.mrf.mxu0  ;;  %v6665_v54 = vpop.f32.mrf.mxu1  ;;  %5549 = vmatmul.mubr.msk.f32.gmra.mxu1 %vm346_vm1, %v6404_v37  ;;  %5587 = vmatmul.mubr.msk.f32.gmra.mxu0 %vm346_vm1, %v6270_v32 }
  0xe0   : > { %7782 = vst [vmem:[#allocation5_spill] sm:$0xff] %v6665_v54  ;;  %5551 = vmatprep.mubr.msk.f32.mxu1 %vm346_vm1, %v7783_v47  ;;  %5589 = vmatprep.mubr.msk.f32.mxu0 %vm346_vm1, %v6276_v0  ;;  %v6693_v0 = vld [vmem:[%s5905_s12 + $0x18a] sm:$0xff] }
  0xe1   : > { %v543_v22 = vpop.f32.mrf.mxu0  ;;  %v6675_v5 = vpop.f32.mrf.mxu1  ;;  %7786 = vst [vmem:[#allocation10_spill] sm:$0xff] %v6693_v0 }
  0xe3   : > { %v6680_v3 = vpop.f32.mrf.mxu0  ;;  %v6682_v54 = vpop.f32.mrf.mxu1  ;;  %5552 = vmatmul.mubr.msk.f32.gmra.mxu1 %vm346_vm1, %v6418_v35  ;;  %5590 = vmatmul.mubr.msk.f32.gmra.mxu0 %vm346_vm1, %v6290_v2 }
  0xe4   : > { %7785 = vst [vmem:[#allocation6_spill] sm:$0xff] %v6682_v54  ;;  %5554 = vmatprep.mubr.msk.f32.mxu1 %vm346_vm1, %v6678_v34  ;;  %5592 = vmatprep.mubr.msk.f32.mxu0 %vm346_vm1, %v6296_v28 }
  0xe5   : > { %v553_v32 = vpop.f32.mrf.mxu0  ;;  %v6695_v37 = vpop.f32.mrf.mxu1 }
  0xe7   : > { %v6697_v47 = vpop.f32.mrf.mxu0  ;;  %v6699_v54 = vpop.f32.mrf.mxu1  ;;  %5555 = vmatmul.mubr.msk.f32.gmra.mxu1 %vm346_vm1, %v6693_v0  ;;  %5593 = vmatmul.mubr.msk.f32.gmra.mxu0 %vm346_vm1, %v6310_v62 }
  0xe8   : > { %7787 = vst [vmem:[#allocation11_spill] sm:$0xff] %v6699_v54  ;;  %5595 = vmatprep.mubr.msk.f32.mxu0 %vm346_vm1, %v6316_v26  ;;  %5609 = vmatprep.mubr.msk.f32.mxu1 %vm346_vm1, %v5947_v13 }
  0xe9   : > { %v6709_v28 = vpop.f32.mrf.mxu0  ;;  %v6711_v2 = vpop.f32.mrf.mxu1 }
  0xea   : > { %7788 = vst [vmem:[#allocation12_spill] sm:$0xff] %v6711_v2 }
  0xeb   : > { %v6713_v35 = vpop.f32.mrf.mxu0  ;;  %v5311_v34 = vpop.f32.mrf.mxu1  ;;  %5596 = vmatmul.mubr.msk.f32.gmra.mxu0 %vm346_vm1, %v6330_v60  ;;  %5610 = vmatmul.mubr.msk.f32.vlgmr.msra.gmra.mxu1 %vm346_vm1, %v5965_v15  ;;  %v4768_v60 = vld [vmem:[%s5905_s12 + $0x198] sm:$0xff] }
  0xec   : > { %v843_v62 = vadd.f32 %v5311_v34, %v5261_v55  ;;  %5598 = vmatprep.mubr.msk.f32.mxu0 %vm346_vm1, %v6336_v24  ;;  %5612 = vmatprep.mubr.msk.f32.mxu1 %vm346_vm1, %v5971_v17 }
  0xed   : > { %v6723_v13 = vpop.f32.mrf.mxu0  ;;  %v837_v26 = vpop.f32.mrf.mxu1 }
  0xee   : > { %v838_v0 = vadd.f32 %v837_v26, %v513_v61 }
  0xef   : > { %v6725_v2 = vpop.f32.mrf.mxu0  ;;  %v5314_v54 = vpop.f32.mrf.mxu1  ;;  %5599 = vmatmul.mubr.msk.f32.gmra.mxu0 %vm346_vm1, %v6350_v58  ;;  %5613 = vmatmul.mubr.msk.f32.gmra.mxu1 %vm346_vm1, %v5985_v19 }
  0xf0   : > { %v853_v15 = vadd.f32 %v5314_v54, %v5264_v53  ;;  %5601 = vmatprep.mubr.msk.f32.mxu0 %vm346_vm1, %v6518_v7  ;;  %5615 = vmatprep.mubr.msk.f32.mxu1 %vm346_vm1, %v5991_v21  ;;  %v4769_v21 = vld [vmem:[%s5905_s12 + $0x1a0] sm:$0xff] }
  0xf1   : > { %v6735_v17 = vpop.f32.mrf.mxu0  ;;  %v847_v24 = vpop.f32.mrf.mxu1 }
  0xf2   : > { %v848_v55 = vadd.f32 %v847_v24, %v523_v1 }
  0xf3   : > { %v6738_v61 = vpop.f32.mrf.mxu0  ;;  %v5317_v34 = vpop.f32.mrf.mxu1  ;;  %5602 = vmatmul.mubr.msk.f32.gmra.mxu0 %vm346_vm1, %v6529_v4  ;;  %5616 = vmatmul.mubr.msk.f32.gmra.mxu1 %vm346_vm1, %v6005_v23 }
  0xf4   : > { %v863_v19 = vadd.f32 %v5317_v34, %v5267_v59  ;;  %5604 = vmatprep.mubr.msk.f32.mxu0 %vm346_vm1, %v4768_v60  ;;  %5618 = vmatprep.mubr.msk.f32.mxu1 %vm346_vm1, %v6011_v25 }
  0xf5   : > { %v6748_v58 = vpop.f32.mrf.mxu0  ;;  %v857_v7 = vpop.f32.mrf.mxu1 }
  0xf6   : > { %v858_v53 = vadd.f32 %v857_v7, %v533_v56 }
  0xf7   : > { %v6750_v1 = vpop.f32.mrf.mxu0  ;;  %v5320_v54 = vpop.f32.mrf.mxu1  ;;  %5605 = vmatmul.mubr.msk.f32.gmra.mxu0 %vm346_vm1, %v4769_v21  ;;  %5619 = vmatmul.mubr.msk.f32.gmra.mxu1 %vm346_vm1, %v6025_v27 }
  0xf8   : > { %v873_v23 = vadd.f32 %v5320_v54, %v5270_v30  ;;  %5621 = vmatprep.mubr.msk.f32.mxu1 %vm346_vm1, %v6031_v29  ;;  %5659 = vmatprep.mubr.msk.f32.mxu0 %vm346_vm1, %v7753_v8 }
  0xf9   : > { %v6759_v25 = vpop.f32.mrf.mxu0  ;;  %v867_v4 = vpop.f32.mrf.mxu1 }
  0xfa   : > { %v868_v59 = vadd.f32 %v867_v4, %v543_v22 }
  0xfb   : > { %v5323_v56 = vpop.f32.mrf.mxu1  ;;  %v5361_v26 = vpop.f32.mrf.mxu0  ;;  %5622 = vmatmul.mubr.msk.f32.gmra.mxu1 %vm346_vm1, %v6042_v31  ;;  %5660 = vmatmul.mubr.msk.f32.vlgmr.msra.gmra.mxu0 %vm346_vm1, %v7755_v12 }
  0xfc   : > { %v883_v27 = vadd.f32 %v5323_v56, %v6680_v3  ;;  %v6766_v30 = vadd.f32 %v5361_v26, %v843_v62  ;;  %5624 = vmatprep.mubr.msk.f32.mxu1 %vm346_vm1, %v6046_v33  ;;  %5662 = vmatprep.mubr.msk.f32.mxu0 %vm346_vm1, %v7757_v16 }
  0xfd   : > { %v877_v29 = vpop.f32.mrf.mxu1  ;;  %v1195_v8 = vpop.f32.mrf.mxu0 }
  0xfe   : > { %v878_v22 = vadd.f32 %v877_v29, %v553_v32  ;;  %v6772_v24 = vadd.f32 %v1195_v8, %v838_v0  ;;  %v4826_v29 = vld [vmem:[%s5905_s12 + $0x139] sm:$0xff] }
  0xff   : > { %v5326_v60 = vpop.f32.mrf.mxu1  ;;  %v5364_v31 = vpop.f32.mrf.mxu0  ;;  %5625 = vmatmul.mubr.msk.f32.gmra.mxu1 %vm346_vm1, %v6064_v36  ;;  %5663 = vmatmul.mubr.msk.f32.gmra.mxu0 %vm346_vm1, %v7760_v51 }
 0x100   : > { %v893_v12 = vadd.f32 %v5326_v60, %v6697_v47  ;;  %v6779_v3 = vadd.f32 %v5364_v31, %v853_v15  ;;  %5627 = vmatprep.mubr.msk.f32.mxu1 %vm346_vm1, %v6070_v38  ;;  %5665 = vmatprep.mubr.msk.f32.mxu0 %vm346_vm1, %v7761_v52 }
 0x101   : > { %v887_v33 = vpop.f32.mrf.mxu1  ;;  %v1205_v16 = vpop.f32.mrf.mxu0 }
 0x102   : > { %v888_v0 = vadd.f32 %v887_v33, %v6709_v28  ;;  %v6786_v32 = vadd.f32 %v1205_v16, %v848_v55  ;;  %v4820_v28 = vld [vmem:[%s5905_s12 + $0xf1] sm:$0xff] }
 0x103   : > { %v5329_v36 = vpop.f32.mrf.mxu1  ;;  %v5367_v62 = vpop.f32.mrf.mxu0  ;;  %5628 = vmatmul.mubr.msk.f32.gmra.mxu1 %vm346_vm1, %v6087_v40  ;;  %5666 = vmatmul.mubr.msk.f32.gmra.mxu0 %vm346_vm1, %v7763_v10  ;;  %v4828_v33 = vld [vmem:[%s5905_s12 + $0x151] sm:$0xff] }
 0x104   : > { %v903_v38 = vadd.f32 %v5329_v36, %v6713_v35  ;;  %v6793_v51 = vadd.f32 %v5367_v62, %v863_v19  ;;  %5630 = vmatprep.mubr.msk.f32.mxu1 %vm346_vm1, %v6093_v42  ;;  %5668 = vmatprep.mubr.msk.f32.mxu0 %vm346_vm1, %v7764_v6  ;;  %v4821_v6 = vld [vmem:[%s5905_s12 + $0xf9] sm:$0xff]  ;;  %v4822_v19 = vld [vmem:[%s5905_s12 + $0x109] sm:$0xff] }
 0x105   : > { %v897_v52 = vpop.f32.mrf.mxu1  ;;  %v1215_v47 = vpop.f32.mrf.mxu0 }
 0x106   : > { %v898_v40 = vadd.f32 %v897_v52, %v6723_v13  ;;  %v6801_v15 = vadd.f32 %v1215_v47, %v858_v53  ;;  %v4830_v52 = vld [vmem:[%s5905_s12 + $0x169] sm:$0xff] }
 0x107   : > { %v5332_v10 = vpop.f32.mrf.mxu1  ;;  %v5370_v55 = vpop.f32.mrf.mxu0  ;;  %5631 = vmatmul.mubr.msk.f32.gmra.mxu1 %vm346_vm1, %v6107_v44  ;;  %5669 = vmatmul.mubr.msk.f32.gmra.mxu0 %vm346_vm1, %v7765_v11 }
 0x108   : > { %v913_v42 = vadd.f32 %v5332_v10, %v6725_v2  ;;  %v6808_v35 = vadd.f32 %v5370_v55, %v873_v23  ;;  %5633 = vmatprep.mubr.msk.f32.mxu1 %vm346_vm1, %v4820_v28  ;;  %5671 = vmatprep.mubr.msk.f32.mxu0 %vm346_vm1, %v7766_v14  ;;  %v4823_v14 = vld [vmem:[%s5905_s12 + $0x111] sm:$0xff]  ;;  %v4824_v23 = vld [vmem:[%s5905_s12 + $0x121] sm:$0xff] }
 0x109   : > { %v907_v13 = vpop.f32.mrf.mxu1  ;;  %v1225_v34 = vpop.f32.mrf.mxu0  ;;  %v4831_v55 = vld [vmem:[%s5905_s12 + $0x171] sm:$0xff] }
 0x10a   : > { %v908_v44 = vadd.f32 %v907_v13, %v6735_v17  ;;  %v6816_v21 = vadd.f32 %v1225_v34, %v868_v59 }
 0x10b   : > { %v5335_v11 = vpop.f32.mrf.mxu1  ;;  %v5373_v7 = vpop.f32.mrf.mxu0  ;;  %5634 = vmatmul.mubr.msk.f32.gmra.mxu1 %vm346_vm1, %v4821_v6  ;;  %5672 = vmatmul.mubr.msk.f32.gmra.mxu0 %vm346_vm1, %v7767_v20 }
 0x10c   : > { %v923_v2 = vadd.f32 %v5335_v11, %v6738_v61  ;;  %v6822_v53 = vadd.f32 %v5373_v7, %v883_v27  ;;  %5636 = vmatprep.mubr.msk.f32.mxu1 %vm346_vm1, %v4822_v19  ;;  %5674 = vmatprep.mubr.msk.f32.mxu0 %vm346_vm1, %v7768_v39  ;;  %v4825_v39 = vld [vmem:[%s5905_s12 + $0x129] sm:$0xff] }
 0x10d   : > { %v917_v17 = vpop.f32.mrf.mxu1  ;;  %v1235_v54 = vpop.f32.mrf.mxu0 }
 0x10e   : > { %v6829_v4 = vadd.f32 %v1235_v54, %v878_v22 }
 0x10f   : > { %v5338_v59 = vpop.f32.mrf.mxu1  ;;  %v5376_v56 = vpop.f32.mrf.mxu0  ;;  %5637 = vmatmul.mubr.msk.f32.gmra.mxu1 %vm346_vm1, %v4823_v14  ;;  %5675 = vmatmul.mubr.msk.f32.gmra.mxu0 %vm346_vm1, %v7769_v41  ;;  %v7793_v14 = vld [vmem:[#allocation27_spill] sm:$0xff] }
 0x110   : > { %v933_v20 = vadd.f32 %v5338_v59, %v6750_v1  ;;  %v6835_v61 = vadd.f32 %v5376_v56, %v893_v12  ;;  %5639 = vmatprep.mubr.msk.f32.mxu1 %vm346_vm1, %v4824_v23  ;;  %5677 = vmatprep.mubr.msk.f32.mxu0 %vm346_vm1, %v7770_v49  ;;  %v4827_v49 = vld [vmem:[%s5905_s12 + $0x141] sm:$0xff]  ;;  %v4834_v23 = vld [vmem:[%s5905_s12 + $0x199] sm:$0xff] }
 0x111   : > { %v927_v26 = vpop.f32.mrf.mxu1  ;;  %v1245_v27 = vpop.f32.mrf.mxu0  ;;  %v4892_v59 = vld [vmem:[%s5905_s12 + $0x13a] sm:$0xff] }
 0x112   : > { %v6842_v8 = vadd.f32 %v1245_v27, %v888_v0  ;;  %v928_v19 = vadd.f32 %v927_v26, %v6759_v25  ;;  %v7794_v26 = vld [vmem:[#allocation7_spill] sm:$0xff]  ;;  %v7795_v27 = vld [vmem:[#allocation4_spill] sm:$0xff] }
 0x113   : > { %v5341_v22 = vpop.f32.mrf.mxu1  ;;  %v5379_v60 = vpop.f32.mrf.mxu0  ;;  %5640 = vmatmul.mubr.msk.f32.gmra.mxu1 %vm346_vm1, %v4825_v39  ;;  %5678 = vmatmul.mubr.msk.f32.gmra.mxu0 %vm346_vm1, %v7771_v43 }
 0x114   : > { %v943_v41 = vadd.f32 %v5341_v22, %v6629_v57  ;;  %v6848_v1 = vadd.f32 %v5379_v60, %v903_v38  ;;  %5642 = vmatprep.mubr.msk.f32.mxu1 %vm346_vm1, %v4826_v29  ;;  %5680 = vmatprep.mubr.msk.f32.mxu0 %vm346_vm1, %v7772_v45  ;;  %v4829_v45 = vld [vmem:[%s5905_s12 + $0x159] sm:$0xff] }
 0x115   : > { %v937_v31 = vpop.f32.mrf.mxu1  ;;  %v1255_v12 = vpop.f32.mrf.mxu0  ;;  %v7796_v22 = vld [vmem:[#allocation6_spill] sm:$0xff] }
 0x116   : > { %v6855_v16 = vadd.f32 %v1255_v12, %v898_v40  ;;  %v938_v29 = vadd.f32 %v937_v31, %v7795_v27  ;;  %v4893_v12 = vld [vmem:[%s5905_s12 + $0x142] sm:$0xff]  ;;  %v4900_v27 = vld [vmem:[%s5905_s12 + $0x19a] sm:$0xff] }
 0x117   : > { %v5344_v0 = vpop.f32.mrf.mxu1  ;;  %v5382_v36 = vpop.f32.mrf.mxu0  ;;  %5643 = vmatmul.mubr.msk.f32.gmra.mxu1 %vm346_vm1, %v4827_v49  ;;  %5681 = vmatmul.mubr.msk.f32.gmra.mxu0 %vm346_vm1, %v7773_v46  ;;  %v918_v46 = vadd.f32 %v917_v17, %v6748_v58 }
 0x118   : > { %v953_v43 = vadd.f32 %v5344_v0, %v6641_v63  ;;  %v6861_v57 = vadd.f32 %v5382_v36, %v913_v42  ;;  %5645 = vmatprep.mubr.msk.f32.mxu1 %vm346_vm1, %v4828_v33  ;;  %5683 = vmatprep.mubr.msk.f32.mxu0 %vm346_vm1, %v7774_v48  ;;  %v7789_v48 = vld [vmem:[#allocation25_spill] sm:$0xff] }
 0x119   : > { %v947_v62 = vpop.f32.mrf.mxu1  ;;  %v1265_v38 = vpop.f32.mrf.mxu0  ;;  %v4894_v36 = vld [vmem:[%s5905_s12 + $0x152] sm:$0xff] }
 0x11a   : > { %v6868_v47 = vadd.f32 %v1265_v38, %v908_v44  ;;  %v7791_v44 = vld [vmem:[#allocation5_spill] sm:$0xff] }
 0x11b   : > { %v5347_v28 = vpop.f32.mrf.mxu1  ;;  %v5385_v40 = vpop.f32.mrf.mxu0  ;;  %5646 = vmatmul.mubr.msk.f32.gmra.mxu1 %vm346_vm1, %v4829_v45  ;;  %5684 = vmatmul.mubr.msk.f32.gmra.mxu0 %vm346_vm1, %v7775_v50 }
 0x11c   : > { %v963_v63 = vadd.f32 %v5347_v28, %v6653_v18  ;;  %v6875_v10 = vadd.f32 %v5385_v40, %v923_v2  ;;  %5648 = vmatprep.mubr.msk.f32.mxu1 %vm346_vm1, %v4830_v52  ;;  %5686 = vmatprep.mubr.msk.f32.mxu0 %vm346_vm1, %v7789_v48  ;;  %v7790_v18 = vld [vmem:[#allocation26_spill] sm:$0xff]  ;;  %v7792_v2 = vld [vmem:[#allocation3_spill] sm:$0xff] }
 0x11d   : > { %v957_v42 = vpop.f32.mrf.mxu1  ;;  %v1275_v6 = vpop.f32.mrf.mxu0  ;;  %v7798_v40 = vld [vmem:[#allocation11_spill] sm:$0xff] }
 0x11e   : > { %v958_v13 = vadd.f32 %v957_v42, %v6663_v9  ;;  %v6882_v50 = vadd.f32 %v1275_v6, %v918_v46  ;;  %v4891_v9 = vld [vmem:[%s5905_s12 + $0x12a] sm:$0xff] }
 0x11f   : > { %v5350_v58 = vpop.f32.mrf.mxu1  ;;  %v5388_v34 = vpop.f32.mrf.mxu0  ;;  %5649 = vmatmul.mubr.msk.f32.gmra.mxu1 %vm346_vm1, %v4831_v55  ;;  %5687 = vmatmul.mubr.msk.f32.gmra.mxu0 %vm346_vm1, %v7790_v18  ;;  %v4895_v55 = vld [vmem:[%s5905_s12 + $0x15a] sm:$0xff]  ;;  %v4896_v6 = vld [vmem:[%s5905_s12 + $0x16a] sm:$0xff] }
 0x120   : > { %v973_v11 = vadd.f32 %v5350_v58, %v7791_v44  ;;  %v6889_v7 = vadd.f32 %v5388_v34, %v933_v20  ;;  %5651 = vmatprep.mubr.msk.f32.mxu1 %vm346_vm1, %v7792_v2  ;;  %5689 = vmatprep.mubr.msk.f32.mxu0 %vm346_vm1, %v7793_v14  ;;  %v7799_v58 = vld [vmem:[#allocation12_spill] sm:$0xff]  ;;  %v4897_v2 = vld [vmem:[%s5905_s12 + $0x172] sm:$0xff] }
 0x121   : > { %v967_v17 = vpop.f32.mrf.mxu1  ;;  %v1285_v54 = vpop.f32.mrf.mxu0 }
 0x122   : > { %v968_v25 = vadd.f32 %v967_v17, %v6675_v5  ;;  %v6899_v56 = vadd.f32 %v1285_v54, %v928_v19  ;;  %v4835_v5 = vld [vmem:[%s5905_s12 + $0x1a1] sm:$0xff] }
 0x123   : > { %v5353_v20 = vpop.f32.mrf.mxu1  ;;  %v5391_v39 = vpop.f32.mrf.mxu0  ;;  %5652 = vmatmul.mubr.msk.f32.gmra.mxu1 %vm346_vm1, %v7794_v26  ;;  %5690 = vmatmul.mubr.msk.f32.gmra.mxu0 %vm346_vm1, %v4891_v9 }
 0x124   : > { %v983_v60 = vadd.f32 %v5353_v20, %v7796_v22  ;;  %v6906_v49 = vadd.f32 %v5391_v39, %v943_v41  ;;  %5654 = vmatprep.mubr.msk.f32.mxu1 %vm346_vm1, %v4834_v23  ;;  %5692 = vmatprep.mubr.msk.f32.mxu0 %vm346_vm1, %v4892_v59  ;;  %v7797_v41 = vld [vmem:[#allocation8_spill] sm:$0xff]  ;;  %v7800_v39 = vld [vmem:[#allocation9_spill] sm:$0xff] }
 0x125   : > { %v977_v33 = vpop.f32.mrf.mxu1  ;;  %v1295_v0 = vpop.f32.mrf.mxu0  ;;  %v948_v28 = vadd.f32 %v947_v62, %v7797_v41 }
 0x126   : > { %v978_v45 = vadd.f32 %v977_v33, %v6695_v37  ;;  %v6914_v38 = vadd.f32 %v1295_v0, %v938_v29 }
 0x127   : > { %v5356_v31 = vpop.f32.mrf.mxu1  ;;  %v5394_v52 = vpop.f32.mrf.mxu0  ;;  %5655 = vmatmul.mubr.msk.f32.gmra.mxu1 %vm346_vm1, %v4835_v5  ;;  %5693 = vmatmul.mubr.msk.f32.gmra.mxu0 %vm346_vm1, %v4893_v12  ;;  %v7801_v5 = vld [vmem:[#allocation10_spill] sm:$0xff] }
 0x128   : > { %v993_v46 = vadd.f32 %v5356_v31, %v7798_v40  ;;  %v6920_v48 = vadd.f32 %v5394_v52, %v953_v43  ;;  %5695 = vmatprep.mubr.msk.f32.mxu0 %vm346_vm1, %v4894_v36 }
 0x129   : > { %v987_v42 = vpop.f32.mrf.mxu1  ;;  %v1305_v37 = vpop.f32.mrf.mxu0 }
 0x12a   : > { %v988_v34 = vadd.f32 %v987_v42, %v7799_v58  ;;  %v6926_v18 = vadd.f32 %v1305_v37, %v948_v28 }
 0x12b   : > { %v5397_v19 = vpop.f32.mrf.mxu0  ;;  %v5411_v44 = vpop.f32.mrf.mxu1  ;;  %5696 = vmatmul.mubr.msk.f32.gmra.mxu0 %vm346_vm1, %v4895_v55 }
 0x12c   : > { %v6929_v62 = vadd.f32 %v5397_v19, %v963_v63  ;;  %v1746_v43 = vadd.f32 %v5411_v44, %v6766_v30  ;;  %5698 = vmatprep.mubr.msk.f32.mxu0 %vm346_vm1, %v4896_v6 }
 0x12d   : > { %v1315_v14 = vpop.f32.mrf.mxu0  ;;  %v1586_v9 = vpop.f32.mrf.mxu1 }
 0x12e   : > { %v6934_v17 = vadd.f32 %v1315_v14, %v958_v13  ;;  %v1745_v54 = vadd.f32 %v1586_v9, %v6772_v24 }
 0x12f   : > { %v5400_v23 = vpop.f32.mrf.mxu0  ;;  %v5414_v59 = vpop.f32.mrf.mxu1  ;;  %5699 = vmatmul.mubr.msk.f32.gmra.mxu0 %vm346_vm1, %v4897_v2 }
 0x130   : > { %v6938_v20 = vadd.f32 %v5400_v23, %v973_v11  ;;  %v1748_v63 = vadd.f32 %v5414_v59, %v6779_v3  ;;  %5701 = vmatprep.mubr.msk.f32.mxu0 %vm346_vm1, %v7800_v39  ;;  %v4901_v3 = vld [vmem:[%s5905_s12 + $0x1a2] sm:$0xff] }
 0x131   : > { %v1325_v30 = vpop.f32.mrf.mxu0  ;;  %v1596_v26 = vpop.f32.mrf.mxu1 }
 0x132   : > { %v6944_v29 = vadd.f32 %v1325_v30, %v968_v25  ;;  %v1747_v13 = vadd.f32 %v1596_v26, %v6786_v32 }
 0x133   : > { %v5403_v24 = vpop.f32.mrf.mxu0  ;;  %v5417_v22 = vpop.f32.mrf.mxu1  ;;  %5702 = vmatmul.mubr.msk.f32.gmra.mxu0 %vm346_vm1, %v7801_v5 }
 0x134   : > { %v6949_v12 = vadd.f32 %v5403_v24, %v983_v60  ;;  %v1750_v11 = vadd.f32 %v5417_v22, %v6793_v51  ;;  %5704 = vmatprep.mubr.msk.f32.mxu0 %vm346_vm1, %v4900_v27 }
 0x135   : > { %v1335_v33 = vpop.f32.mrf.mxu0  ;;  %v1606_v0 = vpop.f32.mrf.mxu1 }
 0x136   : > { %v6954_v36 = vadd.f32 %v1335_v33, %v978_v45  ;;  %v1749_v25 = vadd.f32 %v1606_v0, %v6801_v15 }
 0x137   : > { %v5406_v31 = vpop.f32.mrf.mxu0  ;;  %v5420_v32 = vpop.f32.mrf.mxu1  ;;  %5705 = vmatmul.mubr.msk.f32.gmra.mxu0 %vm346_vm1, %v4901_v3 }
 0x138   : > { %v6958_v52 = vadd.f32 %v5406_v31, %v993_v46  ;;  %v1752_v60 = vadd.f32 %v5420_v32, %v6808_v35 }
 0x139   : > { %v1345_v41 = vpop.f32.mrf.mxu0  ;;  %v1616_v28 = vpop.f32.mrf.mxu1 }
 0x13a   : > { %v6961_v51 = vadd.f32 %v1345_v41, %v988_v34  ;;  %v1751_v40 = vadd.f32 %v1616_v28, %v6816_v21 }
 0x13b   : > { %v5423_v55 = vpop.f32.mrf.mxu1  ;;  %v5461_v42 = vpop.f32.mrf.mxu0 }
 0x13c   : > { %v1754_v45 = vadd.f32 %v5423_v55, %v6822_v53  ;;  %v6965_v37 = vadd.f32 %v5461_v42, %v1746_v43 }
 0x13d   : > { %v1626_v15 = vpop.f32.mrf.mxu1  ;;  %v1976_v6 = vpop.f32.mrf.mxu0 }
 0x13e   : > { %v1753_v58 = vadd.f32 %v1626_v15, %v6829_v4  ;;  %v6968_v46 = vadd.f32 %v1976_v6, %v1745_v54 }
 0x13f   : > { %v5426_v19 = vpop.f32.mrf.mxu1  ;;  %v5464_v35 = vpop.f32.mrf.mxu0 }
 0x140   : > { %v1756_v44 = vadd.f32 %v5426_v19, %v6835_v61  ;;  %v6971_v34 = vadd.f32 %v5464_v35, %v1748_v63 }
 0x141   : > { %v1636_v2 = vpop.f32.mrf.mxu1  ;;  %v1986_v21 = vpop.f32.mrf.mxu0 }
 0x142   : > { %v1755_v14 = vadd.f32 %v1636_v2, %v6842_v8  ;;  %v6974_v9 = vadd.f32 %v1986_v21, %v1747_v13 }
 0x143   : > { %v5429_v53 = vpop.f32.mrf.mxu1  ;;  %v5467_v43 = vpop.f32.mrf.mxu0 }
 0x144   : > { %v1758_v23 = vadd.f32 %v5429_v53, %v6848_v1  ;;  %v6977_v59 = vadd.f32 %v5467_v43, %v1750_v11 }
 0x145   : > { %v1646_v4 = vpop.f32.mrf.mxu1  ;;  %v1996_v54 = vpop.f32.mrf.mxu0 }
 0x146   : > { %v1757_v39 = vadd.f32 %v1646_v4, %v6855_v16  ;;  %v6980_v30 = vadd.f32 %v1996_v54, %v1749_v25 }
 0x147   : > { %v5432_v61 = vpop.f32.mrf.mxu1  ;;  %v5470_v63 = vpop.f32.mrf.mxu0 }
 0x148   : > { %v1760_v26 = vadd.f32 %v5432_v61, %v6861_v57  ;;  %v6983_v27 = vadd.f32 %v5470_v63, %v1752_v60 }
 0x149   : > { %v1656_v8 = vpop.f32.mrf.mxu1  ;;  %v2006_v13 = vpop.f32.mrf.mxu0 }
 0x14a   : > { %v1759_v24 = vadd.f32 %v1656_v8, %v6868_v47  ;;  %v6986_v22 = vadd.f32 %v2006_v13, %v1751_v40 }
 0x14b   : > { %v5435_v1 = vpop.f32.mrf.mxu1  ;;  %v5473_v5 = vpop.f32.mrf.mxu0 }
 0x14c   : > { %v1762_v11 = vadd.f32 %v5435_v1, %v6875_v10  ;;  %v6989_v3 = vadd.f32 %v5473_v5, %v1754_v45 }
 0x14d   : > { %v1666_v16 = vpop.f32.mrf.mxu1  ;;  %v2016_v33 = vpop.f32.mrf.mxu0 }
 0x14e   : > { %v1761_v0 = vadd.f32 %v1666_v16, %v6882_v50  ;;  %v6992_v25 = vadd.f32 %v2016_v33, %v1753_v58 }
 0x14f   : > { %v5438_v57 = vpop.f32.mrf.mxu1  ;;  %v5476_v31 = vpop.f32.mrf.mxu0 }
 0x150   : > { %v1764_v32 = vadd.f32 %v5438_v57, %v6889_v7  ;;  %v6995_v60 = vadd.f32 %v5476_v31, %v1756_v44 }
 0x151   : > { %v1676_v47 = vpop.f32.mrf.mxu1  ;;  %v2026_v41 = vpop.f32.mrf.mxu0 }
 0x152   : > { %v1763_v28 = vadd.f32 %v1676_v47, %v6899_v56  ;;  %v6998_v40 = vadd.f32 %v2026_v41, %v1755_v14 }
 0x153   : > { %v5441_v10 = vpop.f32.mrf.mxu1  ;;  %v5479_v55 = vpop.f32.mrf.mxu0 }
 0x154   : > { %v1766_v42 = vadd.f32 %v5441_v10, %v6906_v49  ;;  %v7001_v45 = vadd.f32 %v5479_v55, %v1758_v23 }
 0x155   : > { %v1686_v50 = vpop.f32.mrf.mxu1  ;;  %v2036_v15 = vpop.f32.mrf.mxu0 }
 0x156   : > { %v1765_v6 = vadd.f32 %v1686_v50, %v6914_v38  ;;  %v7004_v58 = vadd.f32 %v2036_v15, %v1757_v39 }
 0x157   : > { %v5444_v7 = vpop.f32.mrf.mxu1  ;;  %v5482_v19 = vpop.f32.mrf.mxu0 }
 0x158   : > { %v1768_v35 = vadd.f32 %v5444_v7, %v6920_v48  ;;  %v7007_v44 = vadd.f32 %v5482_v19, %v1760_v26 }
 0x159   : > { %v1696_v56 = vpop.f32.mrf.mxu1  ;;  %v2046_v2 = vpop.f32.mrf.mxu0 }
 0x15a   : > { %v1767_v21 = vadd.f32 %v1696_v56, %v6926_v18  ;;  %v7010_v14 = vadd.f32 %v2046_v2, %v1759_v24 }
 0x15b   : > { %v5447_v49 = vpop.f32.mrf.mxu1  ;;  %v5485_v53 = vpop.f32.mrf.mxu0 }
 0x15c   : > { %v1770_v43 = vadd.f32 %v5447_v49, %v6929_v62  ;;  %v7013_v23 = vadd.f32 %v5485_v53, %v1762_v11 }
 0x15d   : > { %v1706_v38 = vpop.f32.mrf.mxu1  ;;  %v2056_v4 = vpop.f32.mrf.mxu0 }
 0x15e   : > { %v1769_v54 = vadd.f32 %v1706_v38, %v6934_v17  ;;  %v7016_v39 = vadd.f32 %v2056_v4, %v1761_v0 }
 0x15f   : > { %v5450_v48 = vpop.f32.mrf.mxu1  ;;  %v5488_v61 = vpop.f32.mrf.mxu0 }
 0x160   : > { %v1772_v63 = vadd.f32 %v5450_v48, %v6938_v20  ;;  %v7019_v26 = vadd.f32 %v5488_v61, %v1764_v32 }
 0x161   : > { %v1716_v18 = vpop.f32.mrf.mxu1  ;;  %v2066_v8 = vpop.f32.mrf.mxu0 }
 0x162   : > { %v1771_v13 = vadd.f32 %v1716_v18, %v6944_v29  ;;  %v7022_v24 = vadd.f32 %v2066_v8, %v1763_v28 }
 0x163   : > { %v5453_v62 = vpop.f32.mrf.mxu1  ;;  %v5491_v1 = vpop.f32.mrf.mxu0 }
 0x164   : > { %v1774_v5 = vadd.f32 %v5453_v62, %v6949_v12  ;;  %v7025_v11 = vadd.f32 %v5491_v1, %v1766_v42 }
 0x165   : > { %v1726_v17 = vpop.f32.mrf.mxu1  ;;  %v2076_v16 = vpop.f32.mrf.mxu0 }
 0x166   : > { %7802 = vst [vmem:[#allocation13_spill] sm:$0xff] %v7025_v11  ;;  %v1773_v33 = vadd.f32 %v1726_v17, %v6954_v36  ;;  %v7028_v0 = vadd.f32 %v2076_v16, %v1765_v6 }
 0x167   : > { %v5456_v20 = vpop.f32.mrf.mxu1  ;;  %v5494_v57 = vpop.f32.mrf.mxu0 }
 0x168   : > { %7803 = vst [vmem:[#allocation14_spill] sm:$0xff] %v7028_v0  ;;  %v1776_v31 = vadd.f32 %v5456_v20, %v6958_v52  ;;  %v7031_v32 = vadd.f32 %v5494_v57, %v1768_v35 }
 0x169   : > { %v1736_v29 = vpop.f32.mrf.mxu1  ;;  %v2086_v47 = vpop.f32.mrf.mxu0 }
 0x16a   : > { %7804 = vst [vmem:[#allocation15_spill] sm:$0xff] %v7031_v32  ;;  %v1775_v41 = vadd.f32 %v1736_v29, %v6961_v51  ;;  %v7034_v28 = vadd.f32 %v2086_v47, %v1767_v21 }
 0x16b   : > { %v5497_v12 = vpop.f32.mrf.mxu0  ;;  %v7036_v10 = vpop.f32.mrf.mxu1 }
 0x16c   : > { %7805 = vst [vmem:[#allocation16_spill] sm:$0xff] %v7034_v28  ;;  %v7038_v55 = vadd.f32 %v5497_v12, %v1770_v43 }
 0x16d   : > { %v2096_v36 = vpop.f32.mrf.mxu0  ;;  %v7040_v42 = vpop.f32.mrf.mxu1 }
 0x16e   : > { %7806 = vst [vmem:[#allocation17_spill] sm:$0xff] %v7038_v55  ;;  %v7042_v50 = vadd.f32 %v2096_v36, %v1769_v54 }
 0x16f   : > { %v5500_v15 = vpop.f32.mrf.mxu0  ;;  %v7044_v52 = vpop.f32.mrf.mxu1 }
 0x170   : > { %7807 = vst [vmem:[#allocation18_spill] sm:$0xff] %v7042_v50  ;;  %v7046_v6 = vadd.f32 %v5500_v15, %v1772_v63 }
 0x171   : > { %v2106_v7 = vpop.f32.mrf.mxu0  ;;  %v7048_v19 = vpop.f32.mrf.mxu1 }
 0x172   : > { %7808 = vst [vmem:[#allocation19_spill] sm:$0xff] %v7046_v6  ;;  %v7050_v51 = vadd.f32 %v2106_v7, %v1771_v13 }
 0x173   : > { %v5503_v35 = vpop.f32.mrf.mxu0  ;;  %v7052_v56 = vpop.f32.mrf.mxu1 }
 0x174   : > { %7809 = vst [vmem:[#allocation20_spill] sm:$0xff] %v7050_v51  ;;  %v7054_v2 = vadd.f32 %v5503_v35, %v1774_v5 }
 0x175   : > { %v2116_v21 = vpop.f32.mrf.mxu0  ;;  %v7056_v49 = vpop.f32.mrf.mxu1 }
 0x176   : > { %7810 = vst [vmem:[#allocation21_spill] sm:$0xff] %v7054_v2  ;;  %v7058_v53 = vadd.f32 %v2116_v21, %v1773_v33 }
 0x177   : > { %v5506_v43 = vpop.f32.mrf.mxu0  ;;  %v7060_v38 = vpop.f32.mrf.mxu1 }
 0x178   : > { %7811 = vst [vmem:[#allocation22_spill] sm:$0xff] %v7058_v53  ;;  %v7062_v4 = vadd.f32 %v5506_v43, %v1776_v31 }
 0x179   : > { %v2126_v54 = vpop.f32.mrf.mxu0  ;;  %v7064_v48 = vpop.f32.mrf.mxu1 }
 0x17a   : > { %7812 = vst [vmem:[#allocation23_spill] sm:$0xff] %v7062_v4  ;;  %v7066_v61 = vadd.f32 %v2126_v54, %v1775_v41 }
 0x17b   : > { %v7068_v63 = vpop.f32.mrf.mxu1  ;;  %v7070_v18 = vpop.f32.mrf.mxu0 }
 0x17c   : > { %7813 = vst [vmem:[#allocation24_spill] sm:$0xff] %v7066_v61 }
 0x17d   : > { %v7072_v8 = vpop.f32.mrf.mxu1  ;;  %v7074_v13 = vpop.f32.mrf.mxu0 }
 0x17f   : > { %v7076_v62 = vpop.f32.mrf.mxu1  ;;  %v7078_v1 = vpop.f32.mrf.mxu0 }
 0x181   : > { %v7080_v5 = vpop.f32.mrf.mxu1  ;;  %v7082_v17 = vpop.f32.mrf.mxu0 }
 0x183   : > { %v7084_v16 = vpop.f32.mrf.mxu1  ;;  %v7086_v33 = vpop.f32.mrf.mxu0 }
 0x185   : > { %v7088_v20 = vpop.f32.mrf.mxu1  ;;  %v7090_v57 = vpop.f32.mrf.mxu0 }
 0x187   : > { %v7092_v31 = vpop.f32.mrf.mxu1  ;;  %v7094_v29 = vpop.f32.mrf.mxu0 }
 0x189   : > { %v7096_v47 = vpop.f32.mrf.mxu1  ;;  %v7098_v41 = vpop.f32.mrf.mxu0 }
 0x18b   : > { %v7100_v12 = vpop.f32.mrf.mxu1  ;;  %v7102_v36 = vpop.f32.mrf.mxu0 }
 0x18d   : > { %v7104_v15 = vpop.f32.mrf.mxu1  ;;  %v7106_v7 = vpop.f32.mrf.mxu0 }
 0x18f   : > { %v7108_v35 = vpop.f32.mrf.mxu1  ;;  %v7110_v21 = vpop.f32.mrf.mxu0 }
 0x191   : > { %v7112_v43 = vpop.f32.mrf.mxu1  ;;  %v7114_v54 = vpop.f32.mrf.mxu0 }
 0x193   : > { %v7116_v61 = vpop.f32.mrf.mxu1  ;;  %v7118_v4 = vpop.f32.mrf.mxu0 }
 0x194   : > { %7814 = vst [vmem:[#allocation28_spill] sm:$0xff] %v7116_v61  ;;  %7815 = vst [vmem:[#allocation29_spill] sm:$0xff] %v7118_v4 }
 0x195   : > { %v7120_v53 = vpop.f32.mrf.mxu1  ;;  %v7122_v2 = vpop.f32.mrf.mxu0 }
 0x196   : > { %7816 = vst [vmem:[#allocation25_spill] sm:$0xff] %v7120_v53  ;;  %7817 = vst [vmem:[#allocation26_spill] sm:$0xff] %v7122_v2 }
 0x197   : > { %v7124_v51 = vpop.f32.mrf.mxu1  ;;  %v7126_v6 = vpop.f32.mrf.mxu0 }
 0x198   : > { %7818 = vst [vmem:[#allocation5_spill] sm:$0xff] %v7124_v51  ;;  %7819 = vst [vmem:[#allocation3_spill] sm:$0xff] %v7126_v6 }
 0x199   : > { %v7128_v50 = vpop.f32.mrf.mxu1  ;;  %v7130_v55 = vpop.f32.mrf.mxu0 }
 0x19a   : > { %7820 = vst [vmem:[#allocation27_spill] sm:$0xff] %v7128_v50  ;;  %7821 = vst [vmem:[#allocation7_spill] sm:$0xff] %v7130_v55 }
 0x19b   : > { %v7132_v28 = vpop.f32.mrf.mxu1  ;;  %v7134_v32 = vpop.f32.mrf.mxu0 }
 0x19c   : > { %7822 = vst [vmem:[#allocation4_spill] sm:$0xff] %v7132_v28  ;;  %7823 = vst [vmem:[#allocation6_spill] sm:$0xff] %v7134_v32 }
 0x19d   : > { %v7136_v0 = vpop.f32.mrf.mxu1  ;;  %v7138_v61 = vpop.f32.mrf.mxu0 }
 0x19e   : > { %7824 = vst [vmem:[#allocation8_spill] sm:$0xff] %v7136_v0  ;;  %7825 = vst [vmem:[#allocation11_spill] sm:$0xff] %v7138_v61 }
 0x19f   : > { %v7140_v4 = vpop.f32.mrf.mxu1  ;;  %v7142_v53 = vpop.f32.mrf.mxu0 }
 0x1a0   : > { %7826 = vst [vmem:[#allocation12_spill] sm:$0xff] %v7140_v4  ;;  %7827 = vst [vmem:[#allocation9_spill] sm:$0xff] %v7142_v53 }
 0x1a1   : > { %v7144_v2 = vpop.f32.mrf.mxu1  ;;  %v7146_v51 = vpop.f32.mrf.mxu0 }
 0x1a2   : > { %7828 = vst [vmem:[#allocation10_spill] sm:$0xff] %v7144_v2  ;;  %7829 = vst [vmem:[#allocation30_spill] sm:$0xff] %v7146_v51 }
 0x1a3   : > { %v7148_v6 = vpop.f32.mrf.mxu1  ;;  %v7150_v50 = vpop.f32.mrf.mxu0 }
 0x1a4   : > { %7830 = vst [vmem:[#allocation31_spill] sm:$0xff] %v7148_v6  ;;  %7831 = vst [vmem:[#allocation32_spill] sm:$0xff] %v7150_v50 }
 0x1a5   : > { %v7152_v55 = vpop.f32.mrf.mxu1  ;;  %v7154_v28 = vpop.f32.mrf.mxu0 }
 0x1a6   : > { %7832 = vst [vmem:[#allocation33_spill] sm:$0xff] %v7152_v55  ;;  %7833 = vst [vmem:[#allocation34_spill] sm:$0xff] %v7154_v28 }
 0x1a7   : > { %v7156_v32 = vpop.f32.mrf.mxu1  ;;  %v7158_v0 = vpop.f32.mrf.mxu0 }
 0x1a8   : > { %7834 = vst [vmem:[#allocation35_spill] sm:$0xff] %v7156_v32  ;;  %7835 = vst [vmem:[#allocation36_spill] sm:$0xff] %v7158_v0  ;;  %v2526_v0 = vadd.f32 %v7036_v10, %v6965_v37  ;;  %v2529_v32 = vadd.f32 %v7056_v49, %v6980_v30  ;;  %v2532_v37 = vadd.f32 %v7060_v38, %v6983_v27 }
 0x1a9   : > { %v7160_v61 = vpop.f32.mrf.mxu1  ;;  %v7162_v4 = vpop.f32.mrf.mxu0  ;;  %v2531_v10 = vadd.f32 %v7064_v48, %v6986_v22  ;;  %v2536_v27 = vadd.f32 %v7076_v62, %v6995_v60  ;;  %v2535_v22 = vadd.f32 %v7080_v5, %v6998_v40  ;;  %v2537_v49 = vadd.f32 %v7088_v20, %v7004_v58  ;;  %v7843_v62 = vld [vmem:[#allocation28_spill] sm:$0xff] }
 0x1aa   : > { %7836 = vst [vmem:[#allocation37_spill] sm:$0xff] %v7160_v61  ;;  %7837 = vst [vmem:[#allocation38_spill] sm:$0xff] %v7162_v4  ;;  %v2920_v60 = vadd.f32 %v7090_v57, %v2529_v32  ;;  %v7225_v40 = vadd.f32 %v7094_v29, %v2532_v37  ;;  %v2544_v48 = vadd.f32 %v7108_v35, %v7019_v26  ;;  %v7847_v57 = vld [vmem:[#allocation26_spill] sm:$0xff]  ;;  %v7848_v29 = vld [vmem:[#allocation15_spill] sm:$0xff] }
 0x1ab   : > { %v7164_v53 = vpop.f32.mrf.mxu0  ;;  %v5611_v2 = vpop.f32.mrf.mxu1  ;;  %v7851_v35 = vld [vmem:[#allocation16_spill] sm:$0xff] }
 0x1ac   : > { %7838 = vst [vmem:[#allocation39_spill] sm:$0xff] %v7164_v53  ;;  %v2525_v53 = vadd.f32 %v7040_v42, %v6968_v46  ;;  %v2534_v46 = vadd.f32 %v7068_v63, %v6989_v3  ;;  %v7249_v63 = vadd.f32 %v7110_v21, %v2536_v27  ;;  %v7852_v21 = vld [vmem:[#allocation27_spill] sm:$0xff] }
 0x1ad   : > { %v7166_v51 = vpop.f32.mrf.mxu0  ;;  %v3147_v6 = vpop.f32.mrf.mxu1 }
 0x1ae   : > { %7839 = vst [vmem:[#allocation40_spill] sm:$0xff] %v7166_v51  ;;  %v2528_v51 = vadd.f32 %v7044_v52, %v6971_v34  ;;  %v2916_v30 = vadd.f32 %v7074_v13, %v2525_v53  ;;  %v7239_v32 = vadd.f32 %v7102_v36, %v2534_v46  ;;  %v7854_v46 = vld [vmem:[#allocation17_spill] sm:$0xff] }
 0x1af   : > { %v7168_v11 = vpop.f32.mrf.mxu0  ;;  %v7170_v50 = vpop.f32.mrf.mxu1 }
 0x1b0   : > { %7840 = vst [vmem:[#allocation41_spill] sm:$0xff] %v7168_v11  ;;  %v2527_v11 = vadd.f32 %v7048_v19, %v6974_v9  ;;  %v2917_v9 = vadd.f32 %v7070_v18, %v2526_v0  ;;  %v2919_v52 = vadd.f32 %v7078_v1, %v2528_v51  ;;  %v2538_v19 = vadd.f32 %v7084_v16, %v7001_v45  ;;  %v7844_v1 = vld [vmem:[#allocation29_spill] sm:$0xff] }
 0x1b1   : > { %v7172_v55 = vpop.f32.mrf.mxu0  ;;  %v7174_v28 = vpop.f32.mrf.mxu1  ;;  %v2540_v51 = vadd.f32 %v7092_v31, %v7007_v44  ;;  %v2539_v45 = vadd.f32 %v7096_v47, %v7010_v14  ;;  %v2541_v44 = vadd.f32 %v7104_v15, %v7016_v39  ;;  %v7254_v18 = vadd.f32 %v7114_v54, %v2535_v22  ;;  %v7261_v39 = vld [vmem:[%s7667_s2] ss:$0 sm:$0xff]  ;;  %v7849_v47 = vld [vmem:[#allocation5_spill] sm:$0xff]  ;;  %v7857_v22 = vld [vmem:[#allocation18_spill] sm:$0xff] }
 0x1b2   : > { %7841 = vst [vmem:[#allocation42_spill] sm:$0xff] %v7172_v55  ;;  %v2530_v55 = vadd.f32 %v7052_v56, %v6977_v59  ;;  %v2533_v59 = vadd.f32 %v7072_v8, %v6992_v25  ;;  %v2918_v3 = vadd.f32 %v7082_v17, %v2527_v11  ;;  %v7230_v11 = vadd.f32 %v7098_v41, %v2531_v10 }
 0x1b3   : > { %v7178_v61 = vpop.f32.mrf.mxu0  ;;  %v7180_v4 = vpop.f32.mrf.mxu1  ;;  %v3307_v14 = vadd.f32 %v5611_v2, %v2917_v9  ;;  %v7842_v2 = vld [vmem:[#allocation13_spill] sm:$0xff]  ;;  %v7266_v5 = vadd.f32 %v7844_v1, %v2538_v19  ;;  %v3306_v17 = vadd.f32 %v3147_v6, %v2916_v30  ;;  %v7271_v31 = vadd.f32 %v7847_v57, %v2537_v49  ;;  %v7853_v6 = vld [vmem:[#allocation7_spill] sm:$0xff]  ;;  %v7855_v9 = vld [vmem:[#allocation4_spill] sm:$0xff] }
 0x1b4   : > { %v2921_v25 = vadd.f32 %v7086_v33, %v2530_v55  ;;  %v2542_v55 = vadd.f32 %v7100_v12, %v7013_v23  ;;  %v7244_v38 = vadd.f32 %v7106_v7, %v2533_v59  ;;  %v2543_v23 = vadd.f32 %v7112_v43, %v7022_v24  ;;  %v7845_v24 = vld [vmem:[#allocation14_spill] sm:$0xff]  ;;  %v7846_v33 = vld [vmem:[#allocation25_spill] sm:$0xff]  ;;  %v7850_v12 = vld [vmem:[#allocation3_spill] sm:$0xff] }
 0x1b5   : > { %v7198_v42 = vpop.f32.mrf.mxu0  ;;  %v7200_v34 = vpop.f32.mrf.mxu1  ;;  %v2546_v26 = vadd.f32 %v7843_v62, %v7842_v2  ;;  %v2545_v20 = vadd.f32 %v7846_v33, %v7845_v24  ;;  %v2548_v41 = vadd.f32 %v7849_v47, %v7848_v29  ;;  %v7276_v36 = vadd.f32 %v7850_v12, %v2540_v51  ;;  %v7856_v30 = vld [vmem:[#allocation6_spill] sm:$0xff]  ;;  %v7858_v19 = vld [vmem:[#allocation8_spill] sm:$0xff]  ;;  %v7860_v62 = vld [vmem:[#allocation19_spill] sm:$0xff] }
 0x1b6   : > { %v2547_v43 = vadd.f32 %v7852_v21, %v7851_v35  ;;  %v7283_v54 = vadd.f32 %v7853_v6, %v2539_v45  ;;  %v2550_v59 = vadd.f32 %v7855_v9, %v7854_v46  ;;  %v7291_v27 = vadd.f32 %v7856_v30, %v2542_v55  ;;  %v7859_v45 = vld [vmem:[#allocation11_spill] sm:$0xff]  ;;  %v7861_v1 = vld [vmem:[#allocation12_spill] sm:$0xff]  ;;  %v7862_v55 = vld [vmem:[#allocation9_spill] sm:$0xff] }
 0x1b7   : > { %v7214_v56 = vpop.f32.mrf.mxu0  ;;  %v7216_v0 = vpop.f32.mrf.mxu1  ;;  %v2549_v49 = vadd.f32 %v7858_v19, %v7857_v22  ;;  %v3309_v51 = vadd.f32 %v7170_v50, %v2919_v52  ;;  %v7299_v2 = vadd.f32 %v7859_v45, %v2541_v44  ;;  %v7308_v33 = vadd.f32 %v7862_v55, %v2544_v48  ;;  %v7863_v57 = vld [vmem:[#allocation20_spill] sm:$0xff]  ;;  %v7864_v29 = vld [vmem:[#allocation10_spill] sm:$0xff]  ;;  %v7867_v48 = vld [vmem:[#allocation31_spill] sm:$0xff] }
 0x1b8   : > { %v2551_v50 = vadd.f32 %v7864_v29, %v7863_v57  ;;  %v3308_v52 = vadd.f32 %v7174_v28, %v2918_v3  ;;  %v3311_v21 = vadd.f32 %v7180_v4, %v2921_v25  ;;  %v7868_v9 = vld [vmem:[#allocation32_spill] sm:$0xff]  ;;  %v3310_v4 = vadd.f32 %v7200_v34, %v2920_v60  ;;  %v7871_v45 = vld [vmem:[#allocation34_spill] sm:$0xff] }
 0x1b9   : > { %v7234_v53 = vpop.f32.mrf.mxu0  ;;  %v7236_v58 = vpop.f32.mrf.mxu1  ;;  %v7323_v30 = vadd.f32 %v7868_v9, %v2546_v26 }
 0x1bb   : > { %v7256_v8 = vpop.f32.mrf.mxu1  ;;  %v5661_v13 = vpop.f32.mrf.mxu0 }
 0x1bc   : > { %v3697_v16 = vadd.f32 %v5661_v13, %v3307_v14 }
 0x1bd   : > { %v7278_v15 = vpop.f32.mrf.mxu1  ;;  %v3537_v7 = vpop.f32.mrf.mxu0 }
 0x1be   : > { %v7286_v37 = vadd.f32 %v7261_v39, %v3697_v16  ;;  %v3696_v10 = vadd.f32 %v3537_v7, %v3306_v17  ;;  %v2552_v17 = vadd.f32 %v7861_v1, %v7860_v62  ;;  %v7865_v7 = vld [vmem:[#allocation30_spill] sm:$0xff]  ;;  %v7332_v62 = vadd.f32 %v7871_v45, %v2545_v20  ;;  %v7872_v1 = vld [vmem:[#allocation23_spill] sm:$0xff] }
 0x1bf   : > { %v7296_v14 = vpop.f32.mrf.mxu1  ;;  %v5664_v13 = vpop.f32.mrf.mxu0  ;;  %v7316_v35 = vadd.f32 %v7865_v7, %v2543_v23  ;;  %v7870_v23 = vld [vmem:[#allocation33_spill] sm:$0xff]  ;;  %v7875_v7 = vld [vmem:[#allocation24_spill] sm:$0xff]  ;;  %v7877_v20 = vld [vmem:[#allocation38_spill] sm:$0xff] }
 0x1c0   : > { %v3800_v16 = vmul.f32 0.70710677, %v7286_v37  ;;  %v7305_v24 = vadd.f32 %v7261_v39, %v3696_v10  ;;  %v3699_v47 = vadd.f32 %v5664_v13, %v3309_v51  ;;  %v7866_v10 = vld [vmem:[#allocation21_spill] sm:$0xff]  ;;  %v7869_v51 = vld [vmem:[#allocation22_spill] sm:$0xff] }
 0x1c1   : > { %v7313_v12 = vpop.f32.mrf.mxu1  ;;  %v3547_v44 = vpop.f32.mrf.mxu0  ;;  %v2554_v46 = vadd.f32 %v7867_v48, %v7866_v10  ;;  %v2553_v13 = vadd.f32 %v7870_v23, %v7869_v51  ;;  %v7876_v10 = vld [vmem:[#allocation37_spill] sm:$0xff]  ;;  %v3313_v48 = vadd.f32 %v7216_v0, %v7225_v40  ;;  %v7878_v51 = vld [vmem:[#allocation39_spill] sm:$0xff]  ;;  %v3312_v0 = vadd.f32 %v7236_v58, %v7230_v11 }
 0x1c2   : > { %5732 = verf.f32 %v3800_v16  ;;  %v3799_v6 = vmul.f32 0.70710677, %v7305_v24  ;;  %v7326_v28 = vadd.f32 %v7261_v39, %v3699_v47  ;;  %v3698_v3 = vadd.f32 %v3547_v44, %v3308_v52  ;;  %v7873_v16 = vld [vmem:[#allocation35_spill] sm:$0xff]  ;;  %v7874_v47 = vld [vmem:[#allocation36_spill] sm:$0xff] }
 0x1c3   : > { %v5629_v22 = vpop.f32.mrf.mxu1  ;;  %v5667_v19 = vpop.f32.mrf.mxu0  ;;  %v2556_v26 = vadd.f32 %v7873_v16, %v7872_v1  ;;  %v7339_v44 = vadd.f32 %v7874_v47, %v2548_v41  ;;  %v2555_v34 = vadd.f32 %v7876_v10, %v7875_v7  ;;  %v7350_v23 = vadd.f32 %v7878_v51, %v2550_v59  ;;  %v7879_v41 = vld [vmem:[#allocation40_spill] sm:$0xff]  ;;  %v7881_v59 = vld [vmem:[#allocation42_spill] sm:$0xff] }
 0x1c4   : > { %5734 = verf.f32 %v3799_v6  ;;  %v3701_v25 = vadd.f32 %v5667_v19, %v3311_v21  ;;  %v3802_v55 = vmul.f32 0.70710677, %v7326_v28  ;;  %v3737_v57 = vadd.f32 %v7261_v39, %v3698_v3 }
 0x1c5   : > { %v3207_v29 = vpop.f32.mrf.mxu1  ;;  %v3557_v52 = vpop.f32.mrf.mxu0  ;;  %v7345_v6 = vadd.f32 %v7877_v20, %v2547_v43  ;;  %v7353_v45 = vadd.f32 %v7879_v41, %v2549_v49  ;;  %v3315_v49 = vadd.f32 %v7256_v8, %v7239_v32  ;;  %v7373_v7 = vadd.f32 %v7198_v42, %v2553_v13 }
 0x1c6   : > { %v3740_v60 = vadd.f32 %v7261_v39, %v3701_v25  ;;  %v3700_v21 = vadd.f32 %v3557_v52, %v3310_v4  ;;  %5736 = verf.f32 %v3802_v55  ;;  %v3801_v9 = vmul.f32 0.70710677, %v3737_v57  ;;  %v7880_v4 = vld [vmem:[#allocation41_spill] sm:$0xff] }
 0x1c7   : > { %v5632_v3 = vpop.f32.mrf.mxu1  ;;  %v5670_v19 = vpop.f32.mrf.mxu0  ;;  %v7359_v43 = vadd.f32 %v7880_v4, %v2552_v17  ;;  %v7364_v52 = vadd.f32 %v7881_v59, %v2551_v50  ;;  %v7370_v17 = vadd.f32 %v7178_v61, %v2554_v46  ;;  %v7377_v50 = vadd.f32 %v7214_v56, %v2556_v26 }
 0x1c8   : > { %v3804_v1 = vmul.f32 0.70710677, %v3740_v60  ;;  %v7356_v25 = vadd.f32 %v7261_v39, %v3700_v21  ;;  %5738 = verf.f32 %v3801_v9  ;;  %v3703_v40 = vadd.f32 %v5670_v19, %v3313_v48 }
 0x1c9   : > { %v3217_v16 = vpop.f32.mrf.mxu1  ;;  %v3567_v55 = vpop.f32.mrf.mxu0  ;;  %v3314_v32 = vadd.f32 %v7278_v15, %v7244_v38  ;;  %v7382_v20 = vadd.f32 %v7234_v53, %v2555_v34  ;;  %v3768_v61 = vmul.f32 0.5, %v7286_v37  ;;  %v3767_v9 = vmul.f32 0.5, %v7305_v24 }
 0x1ca   : > { %5740 = verf.f32 %v3804_v1  ;;  %v3803_v47 = vmul.f32 0.70710677, %v7356_v25  ;;  %v3742_v11 = vadd.f32 %v7261_v39, %v3703_v40  ;;  %v3702_v58 = vadd.f32 %v3567_v55, %v3312_v0 }
 0x1cb   : > { %v5635_v10 = vpop.f32.mrf.mxu1  ;;  %v5673_v21 = vpop.f32.mrf.mxu0  ;;  %v3317_v56 = vadd.f32 %v7296_v14, %v7249_v63  ;;  %v3316_v53 = vadd.f32 %v7313_v12, %v7254_v18  ;;  %v3319_v34 = vadd.f32 %v5629_v22, %v7266_v5  ;;  %v3770_v1 = vmul.f32 0.5, %v7326_v28 }
 0x1cc   : > { %5742 = verf.f32 %v3803_v47  ;;  %v3705_v8 = vadd.f32 %v5673_v21, %v3315_v49  ;;  %v3806_v42 = vmul.f32 0.70710677, %v3742_v11  ;;  %v3741_v46 = vadd.f32 %v7261_v39, %v3702_v58 }
 0x1cd   : > { %v3227_v13 = vpop.f32.mrf.mxu1  ;;  %v3577_v48 = vpop.f32.mrf.mxu0  ;;  %v3769_v14 = vmul.f32 0.5, %v3737_v57  ;;  %v3318_v0 = vadd.f32 %v3207_v29, %v7271_v31  ;;  %v3772_v22 = vmul.f32 0.5, %v3740_v60  ;;  %v3321_v59 = vadd.f32 %v5632_v3, %v7276_v36 }
 0x1ce   : > { %v3744_v26 = vadd.f32 %v7261_v39, %v3705_v8  ;;  %v3704_v38 = vadd.f32 %v3577_v48, %v3314_v32  ;;  %5744 = verf.f32 %v3806_v42  ;;  %v3805_v37 = vmul.f32 0.70710677, %v3741_v46 }
 0x1cf   : > { %v5733_v15 = vpop.eup %5732  ;;  %v5638_v19 = vpop.f32.mrf.mxu1  ;;  %v3771_v57 = vmul.f32 0.5, %v7356_v25  ;;  %v3320_v29 = vadd.f32 %v3217_v16, %v7283_v54  ;;  %v3323_v60 = vadd.f32 %v5635_v10, %v7291_v27  ;;  %v3322_v16 = vadd.f32 %v3227_v13, %v7299_v2 }
 0x1d0   : > { %v5676_v51 = vpop.f32.mrf.mxu0  ;;  %v3864_v41 = vadd.f32 1.0, %v5733_v15  ;;  %v3808_v24 = vmul.f32 0.70710677, %v3744_v26  ;;  %v3743_v4 = vadd.f32 %v7261_v39, %v3704_v38  ;;  %5746 = verf.f32 %v3805_v37 }
 0x1d1   : > { %v5735_v63 = vpop.eup %5734  ;;  %v3707_v40 = vadd.f32 %v5676_v51, %v3317_v56  ;;  %v3237_v55 = vpop.f32.mrf.mxu1  ;;  %v3774_v56 = vmul.f32 0.5, %v3742_v11  ;;  %v3773_v37 = vmul.f32 0.5, %v3741_v46  ;;  %v3776_v51 = vmul.f32 0.5, %v3744_v26 }
 0x1d2   : > { %v3587_v18 = vpop.f32.mrf.mxu0  ;;  %v3896_v12 = vmul.f32 %v3864_v41, %v3768_v61  ;;  %v3863_v5 = vadd.f32 1.0, %v5735_v63  ;;  %5748 = verf.f32 %v3808_v24  ;;  %v3807_v49 = vmul.f32 0.70710677, %v3743_v4 }
 0x1d3   : > { %v3746_v28 = vadd.f32 %v7261_v39, %v3707_v40  ;;  %v3706_v47 = vadd.f32 %v3587_v18, %v3316_v53  ;;  %v5641_v58 = vpop.f32.mrf.mxu1  ;;  %v5737_v32 = vpop.eup %5736  ;;  %v3325_v63 = vadd.f32 %v5638_v19, %v7308_v33  ;;  %v3775_v46 = vmul.f32 0.5, %v3743_v4 }
 0x1d4   : > { %v5679_v21 = vpop.f32.mrf.mxu0  ;;  %3929 = vst.msk [vmem:[#allocation2 + $0x8] sm:$0xff] %vm3927_vm2, %v3896_v12  ;;  %v3895_v31 = vmul.f32 %v3863_v5, %v3767_v9  ;;  %v3866_v61 = vadd.f32 1.0, %v5737_v32  ;;  %5750 = verf.f32 %v3807_v49  ;;  %v3324_v26 = vadd.f32 %v3237_v55, %v7316_v35 }
 0x1d5   : > { %v3709_v8 = vadd.f32 %v5679_v21, %v3319_v34  ;;  %v3810_v36 = vmul.f32 0.70710677, %v3746_v28  ;;  %v3247_v3 = vpop.f32.mrf.mxu1  ;;  %v5739_v48 = vpop.eup %5738  ;;  %v3745_v38 = vadd.f32 %v7261_v39, %v3706_v47  ;;  %v3327_v19 = vadd.f32 %v5641_v58, %v7323_v30 }
 0x1d6   : > { %v3597_v42 = vpop.f32.mrf.mxu0  ;;  %3928 = vst.msk [vmem:[#allocation2] sm:$0xff] %vm3927_vm2, %v3895_v31  ;;  %v3898_v53 = vmul.f32 %v3866_v61, %v3770_v1  ;;  %v3865_v54 = vadd.f32 1.0, %v5739_v48  ;;  %v3326_v61 = vadd.f32 %v3247_v3, %v7332_v62 }
 0x1d7   : > { %v3748_v9 = vadd.f32 %v7261_v39, %v3709_v8  ;;  %v3708_v15 = vadd.f32 %v3597_v42, %v3318_v0  ;;  %v5741_v25 = vpop.eup %5740  ;;  %5752 = verf.f32 %v3810_v36  ;;  %v5644_v27 = vpop.f32.mrf.mxu1  ;;  %v3809_v41 = vmul.f32 0.70710677, %v3745_v38 }
 0x1d8   : > { %v5682_v10 = vpop.f32.mrf.mxu0  ;;  %v3868_v34 = vadd.f32 1.0, %v5741_v25  ;;  %3931 = vst.msk [vmem:[#allocation2 + $0x18] sm:$0xff] %vm3927_vm2, %v3898_v53  ;;  %v3897_v11 = vmul.f32 %v3865_v54, %v3769_v14  ;;  %v7415_v55 = vmul.f32 0.5, %v3745_v38  ;;  %v3329_v62 = vadd.f32 %v5644_v27, %v7339_v44 }
 0x1d9   : > { %v5743_v24 = vpop.eup %5742  ;;  %v3812_v40 = vmul.f32 0.70710677, %v3748_v9  ;;  %v3747_v0 = vadd.f32 %v7261_v39, %v3708_v15  ;;  %v3257_v1 = vpop.f32.mrf.mxu1  ;;  %5754 = verf.f32 %v3809_v41  ;;  %v3711_v13 = vadd.f32 %v5682_v10, %v3321_v59 }
 0x1da   : > { %v3607_v18 = vpop.f32.mrf.mxu0  ;;  %v3900_v12 = vmul.f32 %v3868_v34, %v3772_v22  ;;  %v3867_v2 = vadd.f32 1.0, %v5743_v24  ;;  %3930 = vst.msk [vmem:[#allocation2 + $0x10] sm:$0xff] %vm3927_vm2, %v3897_v11  ;;  %v3778_v59 = vmul.f32 0.5, %v3746_v28  ;;  %v7420_v15 = vmul.f32 0.5, %v3748_v9 }
 0x1db   : > { %5756 = verf.f32 %v3812_v40  ;;  %v3811_v5 = vmul.f32 0.70710677, %v3747_v0  ;;  %v5647_v49 = vpop.f32.mrf.mxu1  ;;  %v5745_v47 = vpop.eup %5744  ;;  %v3750_v22 = vadd.f32 %v7261_v39, %v3711_v13  ;;  %v3710_v21 = vadd.f32 %v3607_v18, %v3320_v29 }
 0x1dc   : > { %v5685_v14 = vpop.f32.mrf.mxu0  ;;  %3933 = vst.msk [vmem:[#allocation2 + $0x28] sm:$0xff] %vm3927_vm2, %v3900_v12  ;;  %v3899_v33 = vmul.f32 %v3867_v2, %v3771_v57  ;;  %v3870_v32 = vadd.f32 1.0, %v5745_v47  ;;  %v7425_v41 = vmul.f32 0.5, %v3747_v0  ;;  %v3328_v24 = vadd.f32 %v3257_v1, %v7345_v6 }
 0x1dd   : > { %5758 = verf.f32 %v3811_v5  ;;  %v3713_v31 = vadd.f32 %v5685_v14, %v3323_v60  ;;  %v3267_v4 = vpop.f32.mrf.mxu1  ;;  %v5747_v35 = vpop.eup %5746  ;;  %v3814_v36 = vmul.f32 0.70710677, %v3750_v22  ;;  %v3749_v57 = vadd.f32 %v7261_v39, %v3710_v21 }
 0x1de   : > { %v3617_v8 = vpop.f32.mrf.mxu0  ;;  %3932 = vst.msk [vmem:[#allocation2 + $0x20] sm:$0xff] %vm3927_vm2, %v3899_v33  ;;  %v3902_v58 = vmul.f32 %v3870_v32, %v3774_v56  ;;  %v3869_v42 = vadd.f32 1.0, %v5747_v35  ;;  %v7430_v44 = vmul.f32 0.5, %v3750_v22  ;;  %v3331_v27 = vadd.f32 %v5647_v49, %v7350_v23 }
 0x1df   : > { %v5749_v30 = vpop.eup %5748  ;;  %v3752_v29 = vadd.f32 %v7261_v39, %v3713_v31  ;;  %v3712_v28 = vadd.f32 %v3617_v8, %v3322_v16  ;;  %5760 = verf.f32 %v3814_v36  ;;  %v3813_v25 = vmul.f32 0.70710677, %v3749_v57  ;;  %v5650_v53 = vpop.f32.mrf.mxu1  ;;  %v3960_v36 = vld [vmem:[#allocation2] ss:$2 sm:$0xff] }
 0x1e0   : > { %v5688_v48 = vpop.f32.mrf.mxu0  ;;  %v3872_v60 = vadd.f32 1.0, %v5749_v30  ;;  %3935 = vst.msk [vmem:[#allocation2 + $0x38] sm:$0xff] %vm3927_vm2, %v3902_v58  ;;  %v3901_v38 = vmul.f32 %v3869_v42, %v3773_v37  ;;  %v7434_v6 = vmul.f32 0.5, %v3749_v57  ;;  %v3330_v1 = vadd.f32 %v3267_v4, %v7353_v45  ;;  %v3992_v42 = vld [vmem:[#allocation2 + $0x1] ss:$2 sm:$0xff] }
 0x1e1   : > { %v3816_v3 = vmul.f32 0.70710677, %v3752_v29  ;;  %v3751_v54 = vadd.f32 %v7261_v39, %v3712_v28  ;;  %v5751_v10 = vpop.eup %5750  ;;  %5762 = verf.f32 %v3813_v25  ;;  %v3715_v16 = vadd.f32 %v5688_v48, %v3325_v63  ;;  %v3277_v0 = vpop.f32.mrf.mxu1  ;;  %v3962_v58 = vld [vmem:[#allocation2 + $0x10] ss:$2 sm:$0xff] }
 0x1e2   : > { %v3627_v56 = vpop.f32.mrf.mxu0  ;;  %v3904_v34 = vmul.f32 %v3872_v60, %v3776_v51  ;;  %3934 = vst.msk [vmem:[#allocation2 + $0x30] sm:$0xff] %vm3927_vm2, %v3901_v38  ;;  %v3871_v9 = vadd.f32 1.0, %v5751_v10  ;;  %v7439_v49 = vmul.f32 0.5, %v3752_v29  ;;  %v3333_v21 = vadd.f32 %v5650_v53, %v7359_v43  ;;  %v3994_v29 = vld [vmem:[#allocation2 + $0x11] ss:$2 sm:$0xff] }
 0x1e3   : > { %5764 = verf.f32 %v3816_v3  ;;  %v3815_v11 = vmul.f32 0.70710677, %v3751_v54  ;;  %v3754_v51 = vadd.f32 %v7261_v39, %v3715_v16  ;;  %v3714_v18 = vadd.f32 %v3627_v56, %v3324_v26  ;;  %v5653_v45 = vpop.f32.mrf.mxu1 }
 0x1e4   : > { %v5691_v37 = vpop.f32.mrf.mxu0  ;;  %v5753_v40 = vpop.eup %5752  ;;  %3937 = vst.msk [vmem:[#allocation2 + $0x48] sm:$0xff] %vm3927_vm2, %v3904_v34  ;;  %v3903_v63 = vmul.f32 %v3871_v9, %v3775_v46  ;;  %v7444_v4 = vmul.f32 0.5, %v3751_v54  ;;  %v7451_v30 = vadd.f32 %v3277_v0, %v7364_v52  ;;  %v7455_v60 = vadd.f32 %v5653_v45, %v7370_v17 }
 0x1e5   : > { %v3874_v12 = vadd.f32 1.0, %v5753_v40  ;;  %5766 = verf.f32 %v3815_v11  ;;  %v3717_v2 = vadd.f32 %v5691_v37, %v3327_v19  ;;  %v3818_v5 = vmul.f32 0.70710677, %v3754_v51  ;;  %v3287_v11 = vpop.f32.mrf.mxu1 }
 0x1e6   : > { %v3637_v13 = vpop.f32.mrf.mxu0  ;;  %v3753_v14 = vadd.f32 %v7261_v39, %v3714_v18  ;;  %v5755_v47 = vpop.eup %5754  ;;  %3936 = vst.msk [vmem:[#allocation2 + $0x40] sm:$0xff] %vm3927_vm2, %v3903_v63  ;;  %v7458_v53 = vmul.f32 0.5, %v3754_v51  ;;  %v4023_v3 = vadd.f32 %v3992_v42, %v3960_v36  ;;  %v4024_v17 = vadd.f32 %v3994_v29, %v3962_v58 }
 0x1e7   : > { %v3906_v23 = vmul.f32 %v3874_v12, %v3778_v59  ;;  %v3756_v26 = vadd.f32 %v7261_v39, %v3717_v2  ;;  %v3716_v46 = vadd.f32 %v3637_v13, %v3326_v61  ;;  %v3873_v19 = vadd.f32 1.0, %v5755_v47  ;;  %v3964_v12 = vld [vmem:[#allocation2 + $0x20] ss:$2 sm:$0xff]  ;;  %v3996_v2 = vld [vmem:[#allocation2 + $0x21] ss:$2 sm:$0xff]  ;;  %v5656_v45 = vpop.f32.mrf.mxu1 }
 0x1e8   : > { %v5694_v33 = vpop.f32.mrf.mxu0  ;;  %v5757_v22 = vpop.eup %5756  ;;  %5768 = verf.f32 %v3818_v5  ;;  %v3817_v32 = vmul.f32 0.70710677, %v3753_v14  ;;  %v7466_v34 = vmul.f32 0.5, %v3753_v14  ;;  %v4039_v37 = vadd.f32 %v4024_v17, %v4023_v3 }
 0x1e9   : > { %3939 = vst.msk [vmem:[#allocation2 + $0x58] sm:$0xff] %vm3927_vm2, %v3906_v23  ;;  %v3876_v31 = vadd.f32 1.0, %v5757_v22  ;;  %v3820_v8 = vmul.f32 0.70710677, %v3756_v26  ;;  %v7447_v59 = vadd.f32 %v7261_v39, %v3716_v46  ;;  %v3905_v57 = vmul.f32 %v3873_v19, %v7415_v55  ;;  %v3966_v19 = vld [vmem:[#allocation2 + $0x30] ss:$2 sm:$0xff] }
 0x1ea   : > { %v3647_v35 = vpop.f32.mrf.mxu0  ;;  %v5759_v61 = vpop.eup %5758  ;;  %5770 = verf.f32 %v3817_v32  ;;  %v3719_v43 = vadd.f32 %v5694_v33, %v3329_v62  ;;  %v7477_v5 = vmul.f32 0.5, %v3756_v26  ;;  %v7480_v47 = vmul.f32 0.25, %v4039_v37  ;;  %v3998_v26 = vld [vmem:[#allocation2 + $0x31] ss:$2 sm:$0xff] }
 0x1eb   : > { %v3908_v28 = vmul.f32 %v3876_v31, %v7420_v15  ;;  %v3875_v48 = vadd.f32 1.0, %v5759_v61  ;;  %5772 = verf.f32 %v3820_v8  ;;  %3938 = vst.msk [vmem:[#allocation2 + $0x50] sm:$0xff] %vm3927_vm2, %v3905_v57  ;;  %v3819_v52 = vmul.f32 0.70710677, %v7447_v59 }
 0x1ec   : > { %v5697_v25 = vpop.f32.mrf.mxu0  ;;  %v7462_v55 = vadd.f32 %v7261_v39, %v3719_v43  ;;  %v3718_v38 = vadd.f32 %v3647_v35, %v3328_v24  ;;  %v5761_v62 = vpop.eup %5760  ;;  %v4055_v31 = vsel %vm3927_vm2, %v7480_v47, 0.0  ;;  %v4025_v35 = vadd.f32 %v3996_v2, %v3964_v12 }
 0x1ed   : > { %3941 = vst.msk [vmem:[#allocation2 + $0x68] sm:$0xff] %vm3927_vm2, %v3908_v28  ;;  %v3907_v15 = vmul.f32 %v3875_v48, %v7425_v41  ;;  %v3721_v54 = vadd.f32 %v5697_v25, %v3331_v27  ;;  %v3878_v10 = vadd.f32 1.0, %v5761_v62  ;;  %5774 = verf.f32 %v3819_v52  ;;  %4056 = vadd.xlane.f32.xlu0 %v4055_v31  ;;  %v3297_v25 = vpop.f32.mrf.mxu1  ;;  %v3968_v17 = vld [vmem:[#allocation2 + $0x40] ss:$2 sm:$0xff] }
 0x1ee   : > { %v3657_v56 = vpop.f32.mrf.mxu0  ;;  %v3822_v16 = vmul.f32 0.70710677, %v7462_v55  ;;  %v5763_v9 = vpop.eup %5762  ;;  %v7471_v24 = vadd.f32 %v7261_v39, %v3718_v38  ;;  %v4026_v57 = vadd.f32 %v3998_v26, %v3966_v19  ;;  %v3337_v29 = vadd.f32 %v5656_v45, %v7377_v50 }
 0x1ef   : > { %3940 = vst.msk [vmem:[#allocation2 + $0x60] sm:$0xff] %vm3927_vm2, %v3907_v15  ;;  %v7474_v41 = vadd.f32 %v7261_v39, %v3721_v54  ;;  %v3720_v40 = vadd.f32 %v3657_v56, %v3330_v1  ;;  %v3910_v0 = vmul.f32 %v3878_v10, %v7430_v44  ;;  %v3877_v18 = vadd.f32 1.0, %v5763_v9  ;;  %v4000_v54 = vld [vmem:[#allocation2 + $0x41] ss:$2 sm:$0xff] }
 0x1f0   : > { %v5700_v27 = vpop.f32.mrf.mxu0  ;;  %v5765_v51 = vpop.eup %5764  ;;  %5776 = verf.f32 %v3822_v16  ;;  %v3821_v14 = vmul.f32 0.70710677, %v7471_v24  ;;  %v3334_v44 = vadd.f32 %v3287_v11, %v7373_v7  ;;  %v3336_v37 = vadd.f32 %v3297_v25, %v7382_v20 }
 0x1f1   : > { %v3723_v63 = vadd.f32 %v5700_v27, %v3333_v21  ;;  %v3880_v13 = vadd.f32 1.0, %v5765_v51  ;;  %3943 = vst.msk [vmem:[#allocation2 + $0x78] sm:$0xff] %vm3927_vm2, %v3910_v0  ;;  %v3909_v1 = vmul.f32 %v3877_v18, %v7434_v6  ;;  %v3824_v33 = vmul.f32 0.70710677, %v7474_v41 }
 0x1f2   : > { %v3667_v23 = vpop.f32.mrf.mxu0  ;;  %v5767_v46 = vpop.eup %5766  ;;  %v7487_v22 = vadd.f32 %v7261_v39, %v3720_v40  ;;  %5778 = verf.f32 %v3821_v14  ;;  %v3970_v9 = vld [vmem:[#allocation2 + $0x50] ss:$2 sm:$0xff]  ;;  %v4002_v51 = vld [vmem:[#allocation2 + $0x51] ss:$2 sm:$0xff]  ;;  %v4027_v19 = vadd.f32 %v4000_v54, %v3968_v17 }
 0x1f3   : > { %v3912_v21 = vmul.f32 %v3880_v13, %v7439_v49  ;;  %v3879_v32 = vadd.f32 1.0, %v5767_v46  ;;  %3942 = vst.msk [vmem:[#allocation2 + $0x70] sm:$0xff] %vm3927_vm2, %v3909_v1  ;;  %5780 = verf.f32 %v3824_v33  ;;  %v7495_v6 = vadd.f32 %v7261_v39, %v3723_v63 }
 0x1f4   : > { %v5703_v8 = vpop.f32.mrf.mxu0  ;;  %v3823_v7 = vmul.f32 0.70710677, %v7487_v22  ;;  %v3722_v61 = vadd.f32 %v3667_v23, %v7451_v30  ;;  %v3787_v13 = vmul.f32 0.5, %v7447_v59  ;;  %v3790_v1 = vmul.f32 0.5, %v7462_v55 }
 0x1f5   : > { %v5769_v36 = vpop.eup %5768  ;;  %3945 = vst.msk [vmem:[#allocation2 + $0x88] sm:$0xff] %vm3927_vm2, %v3912_v21  ;;  %v3911_v49 = vmul.f32 %v3879_v32, %v7444_v4  ;;  %v3725_v43 = vadd.f32 %v5703_v8, %v7455_v60  ;;  %v3826_v28 = vmul.f32 0.70710677, %v7495_v6  ;;  %v4040_v4 = vadd.f32 %v4026_v57, %v4025_v35 }
 0x1f6   : > { %v3677_v58 = vpop.f32.mrf.mxu0  ;;  %v3882_v42 = vadd.f32 1.0, %v5769_v36  ;;  %5782 = verf.f32 %v3823_v7  ;;  %v7505_v52 = vadd.f32 %v7261_v39, %v3722_v61  ;;  %v3972_v0 = vld [vmem:[#allocation2 + $0x60] ss:$2 sm:$0xff]  ;;  %v4004_v20 = vld [vmem:[#allocation2 + $0x61] ss:$2 sm:$0xff]  ;;  %v4028_v32 = vadd.f32 %v4002_v51, %v3970_v9 }
 0x1f7   : > { %v5771_v48 = vpop.eup %5770  ;;  %3944 = vst.msk [vmem:[#allocation2 + $0x80] sm:$0xff] %vm3927_vm2, %v3911_v49  ;;  %v7508_v30 = vadd.f32 %v7261_v39, %v3725_v43  ;;  %v3724_v38 = vadd.f32 %v3677_v58, %v3334_v44  ;;  %5784 = verf.f32 %v3826_v28  ;;  %v7512_v16 = vmul.f32 0.25, %v4040_v4 }
 0x1f8   : > { %v5706_v60 = vpop.f32.mrf.mxu0  ;;  %v5773_v62 = vpop.eup %5772  ;;  %v3914_v15 = vmul.f32 %v3882_v42, %v7458_v53  ;;  %v3881_v50 = vadd.f32 1.0, %v5771_v48  ;;  %v3825_v10 = vmul.f32 0.70710677, %v7505_v52  ;;  %v4029_v45 = vadd.f32 %v4004_v20, %v3972_v0 }
 0x1f9   : > { %v3727_v3 = vadd.f32 %v5706_v60, %v3337_v29  ;;  %v3884_v56 = vadd.f32 1.0, %v5773_v62  ;;  %v3828_v40 = vmul.f32 0.70710677, %v7508_v30  ;;  %v7519_v53 = vadd.f32 %v7261_v39, %v3724_v38 }
 0x1fa   : > { %3947 = vst.msk [vmem:[#allocation2 + $0x98] sm:$0xff] %vm3927_vm2, %v3914_v15  ;;  %v3913_v11 = vmul.f32 %v3881_v50, %v7466_v34  ;;  %v3687_v27 = vpop.f32.mrf.mxu0  ;;  %v5775_v18 = vpop.eup %5774  ;;  %5786 = verf.f32 %v3825_v10  ;;  %v4058_v12 = vsel %vm3927_vm2, %v7512_v16, 0.0  ;;  %v3974_v34 = vld [vmem:[#allocation2 + $0x70] ss:$2 sm:$0xff]  ;;  %v4006_v46 = vld [vmem:[#allocation2 + $0x71] ss:$2 sm:$0xff]  ;;  %v4041_v35 = vadd.f32 %v4028_v32, %v4027_v19 }
 0x1fb   : > { %v3916_v63 = vmul.f32 %v3884_v56, %v7477_v5  ;;  %v7525_v2 = vadd.f32 %v7261_v39, %v3727_v3  ;;  %v3883_v14 = vadd.f32 1.0, %v5775_v18  ;;  %4059 = vadd.xlane.f32.xlu0 %v4058_v12  ;;  %5788 = verf.f32 %v3828_v40 }
 0x1fc   : > { %3946 = vst.msk [vmem:[#allocation2 + $0x90] sm:$0xff] %vm3927_vm2, %v3913_v11  ;;  %v3827_v23 = vmul.f32 0.70710677, %v7519_v53  ;;  %v3726_v33 = vadd.f32 %v3687_v27, %v3336_v37  ;;  %v4030_v31 = vadd.f32 %v4006_v46, %v3974_v34  ;;  %v3789_v61 = vmul.f32 0.5, %v7471_v24 }
 0x1fd   : > { %v5777_v5 = vpop.eup %5776  ;;  %3949 = vst.msk [vmem:[#allocation2 + $0xa8] sm:$0xff] %vm3927_vm2, %v3916_v63  ;;  %v3830_v44 = vmul.f32 0.70710677, %v7525_v2  ;;  %v3915_v26 = vmul.f32 %v3883_v14, %v3787_v13  ;;  %v3791_v29 = vmul.f32 0.5, %v7487_v22  ;;  %v7542_v28 = vmul.f32 0.25, %v4041_v35 }
 0x1fe   : > { %v3886_v21 = vadd.f32 1.0, %v5777_v5  ;;  %5790 = verf.f32 %v3827_v23  ;;  %v7534_v59 = vadd.f32 %v7261_v39, %v3726_v33  ;;  %v3976_v55 = vld [vmem:[#allocation2 + $0x80] ss:$2 sm:$0xff]  ;;  %v4008_v36 = vld [vmem:[#allocation2 + $0x81] ss:$2 sm:$0xff]  ;;  %v4042_v58 = vadd.f32 %v4030_v31, %v4029_v45 }
 0x1ff   : > { %5792 = verf.f32 %v3830_v44  ;;  %v5779_v8 = vpop.eup %5778  ;;  %3948 = vst.msk [vmem:[#allocation2 + $0xa0] sm:$0xff] %vm3927_vm2, %v3915_v26  ;;  %v3792_v39 = vmul.f32 0.5, %v7474_v41  ;;  %v4031_v60 = vadd.f32 %v4008_v36, %v3976_v55  ;;  %v4061_v50 = vsel %vm3927_vm2, %v7542_v28, 0.0 }
 0x200   : > { %v3918_v7 = vmul.f32 %v3886_v21, %v3790_v1  ;;  %v5781_v49 = vpop.eup %5780  ;;  %v3885_v57 = vadd.f32 1.0, %v5779_v8  ;;  %v3829_v43 = vmul.f32 0.70710677, %v7534_v59  ;;  %v7544_v4 = vmul.f32 0.25, %v4042_v58  ;;  %4062 = vadd.xlane.f32.xlu1 %v4061_v50 }
 0x201   : > { %v3888_v42 = vadd.f32 1.0, %v5781_v49  ;;  %v3794_v22 = vmul.f32 0.5, %v7495_v6  ;;  %v3793_v27 = vmul.f32 0.5, %v7505_v52  ;;  %v3796_v6 = vmul.f32 0.5, %v7508_v30 }
 0x202   : > { %3951 = vst.msk [vmem:[#allocation2 + $0xb8] sm:$0xff] %vm3927_vm2, %v3918_v7  ;;  %v3917_v25 = vmul.f32 %v3885_v57, %v3789_v61  ;;  %5794 = verf.f32 %v3829_v43  ;;  %v4064_v56 = vsel %vm3927_vm2, %v7544_v4, 0.0  ;;  %v3795_v23 = vmul.f32 0.5, %v7519_v53 }
 0x203   : > { %v5783_v48 = vpop.eup %5782  ;;  %v3978_v38 = vld [vmem:[#allocation2 + $0x90] ss:$2 sm:$0xff]  ;;  %v4010_v24 = vld [vmem:[#allocation2 + $0x91] ss:$2 sm:$0xff]  ;;  %v3920_v62 = vmul.f32 %v3888_v42, %v3792_v39  ;;  %v3798_v30 = vmul.f32 0.5, %v7525_v2  ;;  %v3797_v53 = vmul.f32 0.5, %v7534_v59 }
 0x204   : > { %v3887_v15 = vadd.f32 1.0, %v5783_v48  ;;  %v4032_v3 = vadd.f32 %v4010_v24, %v3978_v38  ;;  %v5785_v41 = vpop.eup %5784  ;;  %3950 = vst.msk [vmem:[#allocation2 + $0xb0] sm:$0xff] %vm3927_vm2, %v3917_v25  ;;  %4065 = vadd.xlane.f32.xlu1 %v4064_v56 }
 0x205   : > { %3953 = vst.msk [vmem:[#allocation2 + $0xc8] sm:$0xff] %vm3927_vm2, %v3920_v62  ;;  %v3890_v54 = vadd.f32 1.0, %v5785_v41 }
 0x206   : > { %v3919_v17 = vmul.f32 %v3887_v15, %v3791_v29  ;;  %v4043_v10 = vadd.f32 %v4032_v3, %v4031_v60  ;;  %v3980_v63 = vld [vmem:[#allocation2 + $0xa0] ss:$2 sm:$0xff]  ;;  %v4012_v12 = vld [vmem:[#allocation2 + $0xa1] ss:$2 sm:$0xff] }
 0x207   : > { %v5787_v9 = vpop.eup %5786  ;;  %v3922_v11 = vmul.f32 %v3890_v54, %v3794_v22  ;;  %v4033_v44 = vadd.f32 %v4012_v12, %v3980_v63 }
 0x208   : > { %3952 = vst.msk [vmem:[#allocation2 + $0xc0] sm:$0xff] %vm3927_vm2, %v3919_v17  ;;  %v7554_v37 = vmul.f32 0.25, %v4043_v10  ;;  %v5789_v40 = vpop.eup %5788  ;;  %v3889_v51 = vadd.f32 1.0, %v5787_v9 }
 0x209   : > { %3955 = vst.msk [vmem:[#allocation2 + $0xd8] sm:$0xff] %vm3927_vm2, %v3922_v11  ;;  %v3892_v0 = vadd.f32 1.0, %v5789_v40 }
 0x20a   : > { %v4067_v18 = vsel %vm3927_vm2, %v7554_v37, 0.0  ;;  %v3921_v20 = vmul.f32 %v3889_v51, %v3793_v27 }
 0x20b   : > { %v5791_v34 = vpop.eup %5790  ;;  %4068 = vadd.xlane.f32.xlu0 %v4067_v18  ;;  %v3924_v14 = vmul.f32 %v3892_v0, %v3796_v6  ;;  %v3982_v46 = vld [vmem:[#allocation2 + $0xb0] ss:$2 sm:$0xff]  ;;  %v4014_v5 = vld [vmem:[#allocation2 + $0xb1] ss:$2 sm:$0xff] }
 0x20c   : > { %v5793_v13 = vpop.eup %5792  ;;  %v3891_v52 = vadd.f32 1.0, %v5791_v34  ;;  %3954 = vst.msk [vmem:[#allocation2 + $0xd0] sm:$0xff] %vm3927_vm2, %v3921_v20  ;;  %v4034_v33 = vadd.f32 %v4014_v5, %v3982_v46 }
 0x20d   : > { %v3894_v1 = vadd.f32 1.0, %v5793_v13  ;;  %3957 = vst.msk [vmem:[#allocation2 + $0xe8] sm:$0xff] %vm3927_vm2, %v3924_v14 }
 0x20e   : > { %v3923_v19 = vmul.f32 %v3891_v52, %v3795_v23  ;;  %v4044_v21 = vadd.f32 %v4034_v33, %v4033_v44 }
 0x20f   : > { %v3926_v26 = vmul.f32 %v3894_v1, %v3798_v30  ;;  %v5795_v32 = vpop.eup %5794  ;;  %v3984_v8 = vld [vmem:[#allocation2 + $0xc0] ss:$2 sm:$0xff]  ;;  %v4016_v7 = vld [vmem:[#allocation2 + $0xc1] ss:$2 sm:$0xff] }
 0x210   : > { %3956 = vst.msk [vmem:[#allocation2 + $0xe0] sm:$0xff] %vm3927_vm2, %v3923_v19  ;;  %v3893_v45 = vadd.f32 1.0, %v5795_v32  ;;  %v4052_v31 = vmul.f32 0.25, %v4044_v21  ;;  %v4035_v49 = vadd.f32 %v4016_v7, %v3984_v8 }
 0x211   : > { %3959 = vst.msk [vmem:[#allocation2 + $0xf8] sm:$0xff] %vm3927_vm2, %v3926_v26 }
 0x212   : > { %v3925_v2 = vmul.f32 %v3893_v45, %v3797_v53  ;;  %v4070_v35 = vsel %vm3927_vm2, %v4052_v31, 0.0 }
 0x213   : > { %4071 = vadd.xlane.f32.xlu1 %v4070_v35  ;;  %v3986_v55 = vld [vmem:[#allocation2 + $0xd0] ss:$2 sm:$0xff]  ;;  %v4018_v36 = vld [vmem:[#allocation2 + $0xd1] ss:$2 sm:$0xff] }
 0x214   : > { %3958 = vst.msk [vmem:[#allocation2 + $0xf0] sm:$0xff] %vm3927_vm2, %v3925_v2  ;;  %v4036_v61 = vadd.f32 %v4018_v36, %v3986_v55  ;;  %v4937_v36 = vld [vmem:[%s7668_s3] ss:$0 sm:$0xff] }
 0x216   : > { %v4045_v57 = vadd.f32 %v4036_v61, %v4035_v49 }
 0x217   : > { %v3988_v58 = vld [vmem:[#allocation2 + $0xe0] ss:$2 sm:$0xff]  ;;  %v4020_v39 = vld [vmem:[#allocation2 + $0xe1] ss:$2 sm:$0xff] }
 0x218   : > { %v4053_v43 = vmul.f32 0.25, %v4045_v57  ;;  %v4037_v48 = vadd.f32 %v4020_v39, %v3988_v58  ;;  %v4938_v57 = vld [vmem:[%s7669_s4] ss:$0 sm:$0xff] }
 0x21a   : > { %v4073_v59 = vsel %vm3927_vm2, %v4053_v43, 0.0 }
 0x21b   : > { %4074 = vadd.xlane.f32.xlu0 %v4073_v59  ;;  %v3990_v42 = vld [vmem:[#allocation2 + $0xf0] ss:$2 sm:$0xff]  ;;  %v4022_v29 = vld [vmem:[#allocation2 + $0xf1] ss:$2 sm:$0xff] }
 0x21c   : > { %v4038_v25 = vadd.f32 %v4022_v29, %v3990_v42 }
 0x21e   : > { %v4046_v38 = vadd.f32 %v4038_v25, %v4037_v48 }
 0x220   : > { %v4054_v24 = vmul.f32 0.25, %v4046_v38 }
 0x222   : > { %v4076_v60 = vsel %vm3927_vm2, %v4054_v24, 0.0 }
 0x223   : > { %4077 = vadd.xlane.f32.xlu1 %v4076_v60 }
 0x276   : > { %v4057_v62 = vpop.xlane.xlu0 %4056 }
 0x277   : > { %v4080_v15 = vmul.f32 0.125, %v4057_v62 }
 0x279   : > { %v4088_v50 = vsub.f32 %v7480_v47, %v4080_v15 }
 0x27b   : > { %v4096_v3 = vmul.f32 %v4088_v50, %v4088_v50 }
 0x27d   : > { %v4104_v41 = vsel %vm3927_vm2, %v4096_v3, 0.0 }
 0x27e   : > { %4105 = vadd.xlane.f32.xlu0 %v4104_v41 }
 0x284   : > { %v4060_v22 = vpop.xlane.xlu0 %4059 }
 0x285   : > { %v4081_v17 = vmul.f32 0.125, %v4060_v22 }
 0x287   : > { %v7575_v54 = vsub.f32 %v7512_v16, %v4081_v17  ;;  %v4190_v16 = vld [vmem:[%s7670_s5] sm:$0xff] }
 0x288   : > { %5707 = vmatprep.subr.mxu1 %v4190_v16 }
 0x289   : > { %v4097_v56 = vmul.f32 %v7575_v54, %v7575_v54  ;;  %v4063_v9 = vpop.xlane.xlu1 %4062  ;;  %5708 = vmatpush3.msra.mxu1 %v4190_v16 }
 0x28a   : > { %v4082_v11 = vmul.f32 0.125, %v4063_v9 }
 0x28b   : > { %v4107_v10 = vsel %vm3927_vm2, %v4097_v56, 0.0 }
 0x28c   : > { %4108 = vadd.xlane.f32.xlu1 %v4107_v10  ;;  %v7581_v40 = vsub.f32 %v7542_v28, %v4082_v11 }
 0x28d   : > { %v4066_v47 = vpop.xlane.xlu1 %4065 }
 0x28e   : > { %v4083_v27 = vmul.f32 0.125, %v4066_v47  ;;  %v4098_v51 = vmul.f32 %v7581_v40, %v7581_v40 }
 0x290   : > { %v7589_v0 = vsub.f32 %v7544_v4, %v4083_v27  ;;  %v4110_v18 = vsel %vm3927_vm2, %v4098_v51, 0.0 }
 0x291   : > { %4111 = vadd.xlane.f32.xlu0 %v4110_v18 }
 0x292   : > { %v4099_v28 = vmul.f32 %v7589_v0, %v7589_v0 }
 0x294   : > { %v4069_v6 = vpop.xlane.xlu0 %4068  ;;  %v4113_v34 = vsel %vm3927_vm2, %v4099_v28, 0.0 }
 0x295   : > { %v4084_v63 = vmul.f32 0.125, %v4069_v6  ;;  %4114 = vadd.xlane.f32.xlu1 %v4113_v34 }
 0x297   : > { %v7595_v12 = vsub.f32 %v7554_v37, %v4084_v63 }
 0x299   : > { %v4100_v20 = vmul.f32 %v7595_v12, %v7595_v12 }
 0x29b   : > { %v4116_v4 = vsel %vm3927_vm2, %v4100_v20, 0.0 }
 0x29c   : > { %4117 = vadd.xlane.f32.xlu0 %v4116_v4  ;;  %v4072_v13 = vpop.xlane.xlu1 %4071 }
 0x29d   : > { %v4085_v14 = vmul.f32 0.125, %v4072_v13 }
 0x29f   : > { %v7601_v23 = vsub.f32 %v4052_v31, %v4085_v14 }
 0x2a1   : > { %v4101_v52 = vmul.f32 %v7601_v23, %v7601_v23 }
 0x2a3   : > { %v4119_v46 = vsel %vm3927_vm2, %v4101_v52, 0.0 }
 0x2a4   : > { %4120 = vadd.xlane.f32.xlu1 %v4119_v46  ;;  %v4075_v37 = vpop.xlane.xlu0 %4074 }
 0x2a5   : > { %v4086_v5 = vmul.f32 0.125, %v4075_v37 }
 0x2a7   : > { %v7606_v30 = vsub.f32 %v4053_v43, %v4086_v5 }
 0x2a9   : > { %v4102_v1 = vmul.f32 %v7606_v30, %v7606_v30 }
 0x2ab   : > { %v4122_v44 = vsel %vm3927_vm2, %v4102_v1, 0.0 }
 0x2ac   : > { %v4078_v33 = vpop.xlane.xlu1 %4077  ;;  %4123 = vadd.xlane.f32.xlu0 %v4122_v44 }
 0x2ad   : > { %v4087_v19 = vmul.f32 0.125, %v4078_v33 }
 0x2af   : > { %v7611_v26 = vsub.f32 %v4054_v24, %v4087_v19 }
 0x2b1   : > { %v4103_v21 = vmul.f32 %v7611_v26, %v7611_v26 }
 0x2b3   : > { %v4125_v32 = vsel %vm3927_vm2, %v4103_v21, 0.0 }
 0x2b4   : > { %4126 = vadd.xlane.f32.xlu1 %v4125_v32 }
 0x307   : > { %v4106_v53 = vpop.xlane.xlu0 %4105 }
 0x308   : > { %v4128_v45 = vmul.f32 0.125, %v4106_v53 }
 0x30a   : > { %v4136_v31 = vadd.f32 1e-05, %v4128_v45 }
 0x30c   : > { %5796 = vrsqrt.f32 %v4136_v31 }
 0x315   : > { %v4109_v8 = vpop.xlane.xlu1 %4108 }
 0x316   : > { %v4129_v7 = vmul.f32 0.125, %v4109_v8 }
 0x318   : > { %v4137_v2 = vadd.f32 1e-05, %v4129_v7 }
 0x319   : > { %v5797_v55 = vpop.eup %5796 }
 0x31a   : > { %5798 = vrsqrt.f32 %v4137_v2  ;;  %v4112_v35 = vpop.xlane.xlu0 %4111  ;;  %v4152_v61 = vmul.f32 %v5797_v55, %v4088_v50 }
 0x31b   : > { %v4130_v49 = vmul.f32 0.125, %v4112_v35 }
 0x31c   : > { %v4167_v39 = vmul.f32 %v4937_v36, %v4152_v61 }
 0x31d   : > { %v4138_v43 = vadd.f32 1e-05, %v4130_v49 }
 0x31e   : > { %v4115_v58 = vpop.xlane.xlu1 %4114  ;;  %v4182_v42 = vadd.f32 %v4938_v57, %v4167_v39 }
 0x31f   : > { %5800 = vrsqrt.f32 %v4138_v43  ;;  %v4131_v59 = vmul.f32 0.125, %v4115_v58 }
 0x320   : > { %5709 = vmatprep.mubr.msk.f32.mxu1 %vm3927_vm2, %v4182_v42 }
 0x321   : > { %v4139_v48 = vadd.f32 1e-05, %v4131_v59 }
 0x323   : > { %5802 = vrsqrt.f32 %v4139_v48 }
 0x325   : > { %v4118_v29 = vpop.xlane.xlu0 %4117 }
 0x326   : > { %v4132_v25 = vmul.f32 0.125, %v4118_v29 }
 0x327   : > { %v5799_v38 = vpop.eup %5798 }
 0x328   : > { %v4140_v24 = vadd.f32 1e-05, %v4132_v25  ;;  %v4153_v60 = vmul.f32 %v5799_v38, %v7575_v54 }
 0x32a   : > { %5804 = vrsqrt.f32 %v4140_v24  ;;  %v4168_v62 = vmul.f32 %v4937_v36, %v4153_v60 }
 0x32c   : > { %v4183_v15 = vadd.f32 %v4938_v57, %v4168_v62  ;;  %v5801_v41 = vpop.eup %5800 }
 0x32d   : > { %v4121_v50 = vpop.xlane.xlu1 %4120  ;;  %v4154_v17 = vmul.f32 %v5801_v41, %v7581_v40 }
 0x32e   : > { %5710 = vmatmul.mubr.msk.f32.vlgmr.msra.gmra.mxu1 %vm3927_vm2, %v4183_v15  ;;  %v4133_v3 = vmul.f32 0.125, %v4121_v50 }
 0x32f   : > { %v4169_v56 = vmul.f32 %v4937_v36, %v4154_v17 }
 0x330   : > { %v4141_v22 = vadd.f32 1e-05, %v4133_v3  ;;  %v5803_v10 = vpop.eup %5802 }
 0x331   : > { %v4155_v9 = vmul.f32 %v5803_v10, %v7589_v0  ;;  %v4184_v11 = vadd.f32 %v4938_v57, %v4169_v56 }
 0x332   : > { %5806 = vrsqrt.f32 %v4141_v22 }
 0x333   : > { %5712 = vmatprep.mubr.msk.f32.mxu1 %vm3927_vm2, %v4184_v11  ;;  %v4170_v51 = vmul.f32 %v4937_v36, %v4155_v9 }
 0x335   : > { %v4124_v47 = vpop.xlane.xlu0 %4123  ;;  %v4185_v18 = vadd.f32 %v4938_v57, %v4170_v51 }
 0x336   : > { %v4134_v54 = vmul.f32 0.125, %v4124_v47 }
 0x337   : > { %v5805_v27 = vpop.eup %5804  ;;  %5713 = vmatmul.mubr.msk.f32.gmra.mxu1 %vm3927_vm2, %v4185_v18 }
 0x338   : > { %v4156_v16 = vmul.f32 %v5805_v27, %v7595_v12  ;;  %v4142_v6 = vadd.f32 1e-05, %v4134_v54 }
 0x33a   : > { %v4171_v63 = vmul.f32 %v4937_v36, %v4156_v16  ;;  %5808 = vrsqrt.f32 %v4142_v6 }
 0x33c   : > { %v4186_v40 = vadd.f32 %v4938_v57, %v4171_v63 }
 0x33d   : > { %v4127_v28 = vpop.xlane.xlu1 %4126 }
 0x33e   : > { %5715 = vmatprep.mubr.msk.f32.mxu1 %vm3927_vm2, %v4186_v40  ;;  %v4135_v0 = vmul.f32 0.125, %v4127_v28 }
 0x33f   : > { %v5807_v34 = vpop.eup %5806 }
 0x340   : > { %v4157_v20 = vmul.f32 %v5807_v34, %v7601_v23  ;;  %v4143_v4 = vadd.f32 1e-05, %v4135_v0  ;;  %v4939_v23 = vld [vmem:[%s7671_s6] ss:$0 sm:$0xff] }
 0x342   : > { %5810 = vrsqrt.f32 %v4143_v4  ;;  %v4172_v13 = vmul.f32 %v4937_v36, %v4157_v20 }
 0x344   : > { %v4187_v14 = vadd.f32 %v4938_v57, %v4172_v13 }
 0x346   : > { %5716 = vmatmul.mubr.msk.f32.gmra.mxu1 %vm3927_vm2, %v4187_v14 }
 0x347   : > { %v5809_v12 = vpop.eup %5808 }
 0x348   : > { %v4158_v52 = vmul.f32 %v5809_v12, %v7606_v30 }
 0x34a   : > { %v4173_v46 = vmul.f32 %v4937_v36, %v4158_v52 }
 0x34c   : > { %v4188_v37 = vadd.f32 %v4938_v57, %v4173_v46 }
 0x34e   : > { %5718 = vmatprep.mubr.msk.f32.mxu1 %vm3927_vm2, %v4188_v37 }
 0x34f   : > { %v5811_v5 = vpop.eup %5810 }
 0x350   : > { %v4159_v1 = vmul.f32 %v5811_v5, %v7611_v26 }
 0x352   : > { %v4174_v44 = vmul.f32 %v4937_v36, %v4159_v1 }
 0x354   : > { %v4189_v33 = vadd.f32 %v4938_v57, %v4174_v44 }
 0x356   : > { %5719 = vmatmul.mubr.msk.f32.gmra.mxu1 %vm3927_vm2, %v4189_v33 }
 0x3ee   : > { %v5711_v19 = vpop.f32.mrf.mxu1 }
 0x3ef   : > { %v4294_v21 = vadd.f32 %v5711_v19, %v4939_v23 }
 0x3f0   : > { %v4288_v32 = vpop.f32.mrf.mxu1 }
 0x3f1   : > { %v4336_v30 = vmul.f32 0.70710677, %v4294_v21  ;;  %v4289_v53 = vadd.f32 %v4939_v23, %v4288_v32  ;;  %v4328_v36 = vmul.f32 0.5, %v4294_v21 }
 0x3f3   : > { %5812 = verf.f32 %v4336_v30  ;;  %v4335_v45 = vmul.f32 0.70710677, %v4289_v53  ;;  %v4327_v43 = vmul.f32 0.5, %v4289_v53 }
 0x3f5   : > { %5814 = verf.f32 %v4335_v45 }
 0x3f7   : > { %v5714_v31 = vpop.f32.mrf.mxu1 }
 0x3f8   : > { %v4304_v8 = vadd.f32 %v5714_v31, %v4939_v23 }
 0x3f9   : > { %v4298_v26 = vpop.f32.mrf.mxu1 }
 0x3fa   : > { %v4338_v7 = vmul.f32 0.70710677, %v4304_v8  ;;  %v4299_v2 = vadd.f32 %v4939_v23, %v4298_v26  ;;  %v4330_v60 = vmul.f32 0.5, %v4304_v8 }
 0x3fc   : > { %5816 = verf.f32 %v4338_v7  ;;  %v4337_v55 = vmul.f32 0.70710677, %v4299_v2  ;;  %v4329_v3 = vmul.f32 0.5, %v4299_v2 }
 0x3fe   : > { %5818 = verf.f32 %v4337_v55 }
 0x400   : > { %v5813_v35 = vpop.eup %5812 }
 0x401   : > { %v4352_v49 = vadd.f32 1.0, %v5813_v35 }
 0x402   : > { %v5815_v61 = vpop.eup %5814 }
 0x403   : > { %v4360_v57 = vmul.f32 %v4352_v49, %v4328_v36  ;;  %v4351_v58 = vadd.f32 1.0, %v5815_v61 }
 0x405   : > { %4369 = vst.msk [vmem:[%s7644_s17 + $0x8] sm:$0xff] %vm4367_vm3, %v4360_v57  ;;  %v4359_v39 = vmul.f32 %v4351_v58, %v4327_v43 }
 0x406   : > { %v5717_v59 = vpop.f32.mrf.mxu1 }
 0x407   : > { %4368 = vst.msk [vmem:[%s7644_s17] sm:$0xff] %vm4367_vm3, %v4359_v39  ;;  %v4314_v42 = vadd.f32 %v5717_v59, %v4939_v23 }
 0x408   : > { %v4308_v29 = vpop.f32.mrf.mxu1 }
 0x409   : > { %v4340_v48 = vmul.f32 0.70710677, %v4314_v42  ;;  %v4309_v25 = vadd.f32 %v4939_v23, %v4308_v29  ;;  %v5817_v24 = vpop.eup %5816  ;;  %v4332_v11 = vmul.f32 0.5, %v4314_v42 }
 0x40a   : > { %v4354_v62 = vadd.f32 1.0, %v5817_v24 }
 0x40b   : > { %5820 = verf.f32 %v4340_v48  ;;  %v4339_v38 = vmul.f32 0.70710677, %v4309_v25  ;;  %v5819_v15 = vpop.eup %5818  ;;  %v4331_v6 = vmul.f32 0.5, %v4309_v25 }
 0x40c   : > { %v4362_v50 = vmul.f32 %v4354_v62, %v4330_v60  ;;  %v4353_v41 = vadd.f32 1.0, %v5819_v15 }
 0x40d   : > { %5822 = verf.f32 %v4339_v38 }
 0x40e   : > { %4371 = vst.msk [vmem:[%s7644_s17 + $0x18] sm:$0xff] %vm4367_vm3, %v4362_v50  ;;  %v4361_v22 = vmul.f32 %v4353_v41, %v4329_v3 }
 0x410   : > { %4370 = vst.msk [vmem:[%s7644_s17 + $0x10] sm:$0xff] %vm4367_vm3, %v4361_v22 }
 0x416   : > { %v5720_v17 = vpop.f32.mrf.mxu1 }
 0x417   : > { %v4324_v56 = vadd.f32 %v5720_v17, %v4939_v23 }
 0x418   : > { %v5821_v10 = vpop.eup %5820  ;;  %v4318_v9 = vpop.f32.mrf.mxu1 }
 0x419   : > { %v4356_v47 = vadd.f32 1.0, %v5821_v10  ;;  %v4342_v27 = vmul.f32 0.70710677, %v4324_v56  ;;  %v4319_v54 = vadd.f32 %v4939_v23, %v4318_v9  ;;  %v4334_v0 = vmul.f32 0.5, %v4324_v56 }
 0x41a   : > { %v5823_v51 = vpop.eup %5822 }
 0x41b   : > { %v4364_v16 = vmul.f32 %v4356_v47, %v4332_v11  ;;  %v4355_v18 = vadd.f32 1.0, %v5823_v51  ;;  %5824 = verf.f32 %v4342_v27  ;;  %v4341_v63 = vmul.f32 0.70710677, %v4319_v54 }
 0x41c   : > { %v4333_v13 = vmul.f32 0.5, %v4319_v54 }
 0x41d   : > { %4373 = vst.msk [vmem:[%s7644_s17 + $0x28] sm:$0xff] %vm4367_vm3, %v4364_v16  ;;  %v4363_v40 = vmul.f32 %v4355_v18, %v4331_v6  ;;  %5826 = verf.f32 %v4341_v63 }
 0x41f   : > { %4372 = vst.msk [vmem:[%s7644_s17 + $0x20] sm:$0xff] %vm4367_vm3, %v4363_v40 }
 0x428   : > { %v5825_v28 = vpop.eup %5824 }
 0x429   : > { %v4358_v34 = vadd.f32 1.0, %v5825_v28 }
 0x42a   : > { %v5827_v20 = vpop.eup %5826 }
 0x42b   : > { %v4366_v4 = vmul.f32 %v4358_v34, %v4334_v0  ;;  %v4357_v14 = vadd.f32 1.0, %v5827_v20 }
 0x42d   : > { %4375 = vst.msk [vmem:[%s7644_s17 + $0x38] sm:$0xff] %vm4367_vm3, %v4366_v4  ;;  %v4365_v12 = vmul.f32 %v4357_v14, %v4333_v13 }
 0x42f   : > { %4374 = vst.msk [vmem:[%s7644_s17 + $0x30] sm:$0xff] %vm4367_vm3, %v4365_v12 }
 0x430 PF: > { %s17_s24 = sadd.s32 1, %s5834_s24  }
 0x431   : > { %p14_p4 = scmp.ge.s32.totalorder %s17_s24, 4  }
 0x433   :  { %16 = sbr.rel (!%p14_p4) target bundleno = 1 (0x1), region = 119 }

</bundles_post_ra>
